<compile_context>
chip_gen: v7x
topology: tpu7x:2x2x1
jax: 0.10.0
libtpu: 0.0.40
codegen_flags: <defaults>
</compile_context>

<pallas_src>
import math

import jax
import jax.numpy as jnp
from jax.experimental import pallas as pl
from jax.experimental.pallas import tpu as pltpu


# --------------------------------------------------------------------------
# Kernel
# --------------------------------------------------------------------------
def bottleneck_kernel(x_ref, w1_ref, s1_ref, t1_ref,
                      w2_ref, s2_ref, t2_ref,
                      w3_ref, s3_ref, t3_ref,
                      out_ref, pad_ref):
    _, H, W, Cin = x_ref.shape
    P = w1_ref.shape[1]
    Cout = w3_ref.shape[1]

    x = x_ref[0]                                   # (H, W, Cin) f32
    x2d = x.reshape(H * W, Cin)

    # ---- conv1 (1x1) + bn1 + relu ---------------------------------------
    h1 = jnp.dot(x2d.astype(jnp.bfloat16), w1_ref[...],
                 preferred_element_type=jnp.float32)
    h1 = jnp.maximum(h1 * s1_ref[...] + t1_ref[...], 0.0)   # (H*W, P) f32

    # ---- conv2 (3x3, pad=1) + bn2 + relu --------------------------------
    # Zero-padded spatial buffer in VMEM, then 9 shifted matmuls.
    pad_ref[...] = jnp.zeros_like(pad_ref)
    pad_ref[1:H + 1, 1:W + 1, :] = h1.reshape(H, W, P)

    acc = jnp.zeros((H * W, P), jnp.float32)
    for k in range(9):                              # statically unrolled taps
        dy, dx = k // 3, k % 3
        patch = pad_ref[dy:dy + H, dx:dx + W, :].reshape(H * W, P)
        acc = acc + jnp.dot(patch.astype(jnp.bfloat16), w2_ref[k],
                            preferred_element_type=jnp.float32)
    h2 = jnp.maximum(acc * s2_ref[...] + t2_ref[...], 0.0)   # (H*W, P) f32

    # ---- conv3 (1x1) + bn3 + residual + relu ----------------------------
    h3 = jnp.dot(h2.astype(jnp.bfloat16), w3_ref[...],
                 preferred_element_type=jnp.float32)
    h3 = h3 * s3_ref[...] + t3_ref[...]
    out = jnp.maximum(h3 + x2d, 0.0)                # identity residual
    out_ref[0] = out.reshape(H, W, Cout).astype(out_ref.dtype)


# --------------------------------------------------------------------------
# Host-side wrapper
# --------------------------------------------------------------------------
def _fold_bn(gamma, beta, mean, var, conv_bias, eps=1e-3):
    """Fold conv bias + inference BatchNorm into per-channel scale/shift."""
    s = gamma / jnp.sqrt(var + eps)
    t = beta + s * (conv_bias - mean)
    return (s.reshape(1, -1).astype(jnp.float32),
            t.reshape(1, -1).astype(jnp.float32))


def bottleneck_forward(x, params):
    """x: (B, H, W, Cin) float32 NHWC.  Identity-residual Bottleneck."""
    B, H, W, Cin = x.shape
    p = params
    P = p["w1"].shape[0]               # planes
    Cout = p["w3"].shape[0]            # planes * 4
    assert Cout == Cin, "identity residual requires inplanes == planes * 4"

    # Weights transposed to (in, out) and cast to bf16 for the MXU.
    w1 = jnp.transpose(p["w1"][:, :, 0, 0]).astype(jnp.bfloat16)         # (Cin, P)
    w2 = jnp.transpose(p["w2"], (2, 3, 1, 0)).reshape(9, P, P).astype(jnp.bfloat16)
    w3 = jnp.transpose(p["w3"][:, :, 0, 0]).astype(jnp.bfloat16)         # (P, Cout)

    s1, t1 = _fold_bn(p["g1"], p["be1"], p["m1"], p["v1"], p["b1"])
    s2, t2 = _fold_bn(p["g2"], p["be2"], p["m2"], p["v2"], p["b2"])
    s3, t3 = _fold_bn(p["g3"], p["be3"], p["m3"], p["v3"], p["b3"])

    flops = int(2 * B * H * W * (Cin * P + 9 * P * P + P * Cout))
    bytes_accessed = int(
        B * H * W * Cin * 4          # x (f32)
        + B * H * W * Cout * 4       # out (f32)
        + (Cin * P + 9 * P * P + P * Cout) * 2   # bf16 weights
        + (4 * P + 2 * Cout) * 4)    # folded BN scale/shift

    const2 = lambda b: (0, 0)        # noqa: E731 - weights stay resident

    return pl.pallas_call(
        bottleneck_kernel,
        out_shape=jax.ShapeDtypeStruct((B, H, W, Cout), jnp.float32),
        grid=(B,),
        in_specs=[
            pl.BlockSpec((1, H, W, Cin), lambda b: (b, 0, 0, 0)),   # x
            pl.BlockSpec((Cin, P), const2),                         # w1
            pl.BlockSpec((1, P), const2),                           # s1
            pl.BlockSpec((1, P), const2),                           # t1
            pl.BlockSpec((9, P, P), lambda b: (0, 0, 0)),           # w2 taps
            pl.BlockSpec((1, P), const2),                           # s2
            pl.BlockSpec((1, P), const2),                           # t2
            pl.BlockSpec((P, Cout), const2),                        # w3
            pl.BlockSpec((1, Cout), const2),                        # s3
            pl.BlockSpec((1, Cout), const2),                        # t3
        ],
        out_specs=pl.BlockSpec((1, H, W, Cout), lambda b: (b, 0, 0, 0)),
        scratch_shapes=[pltpu.VMEM((H + 2, W + 2, P), jnp.float32)],
        compiler_params=pltpu.CompilerParams(
            dimension_semantics=("parallel",)),
        cost_estimate=pl.CostEstimate(flops=flops, transcendentals=0,
                                      bytes_accessed=bytes_accessed),
    )(x, w1, s1, t1, w2, s2, t2, w3, s3, t3)


# --------------------------------------------------------------------------
# Parameters (PyTorch-style layout) and pure-JAX reference
# --------------------------------------------------------------------------
def init_params(key, inplanes, planes, expansion=4):
    outplanes = planes * expansion
    ks = jax.random.split(key, 18)

    def conv_w(k, o, i, kh, kw):
        bound = 1.0 / math.sqrt(i * kh * kw)
        return jax.random.uniform(k, (o, i, kh, kw), jnp.float32, -bound, bound)

    def conv_b(k, o, fan_in):
        bound = 1.0 / math.sqrt(fan_in)
        return jax.random.uniform(k, (o,), jnp.float32, -bound, bound)

    def bn_p(kg, kb, km, kv, c):
        g = jax.random.uniform(kg, (c,), jnp.float32, 0.5, 1.5)
        be = jax.random.uniform(kb, (c,), jnp.float32, -0.1, 0.1)
        m = jax.random.uniform(km, (c,), jnp.float32, -0.1, 0.1)
        v = jax.random.uniform(kv, (c,), jnp.float32, 0.5, 1.5)
        return g, be, m, v

    w1, b1 = conv_w(ks[0], planes, inplanes, 1, 1), conv_b(ks[1], planes, inplanes)
    g1, be1, m1, v1 = bn_p(ks[2], ks[3], ks[4], ks[5], planes)
    w2, b2 = conv_w(ks[6], planes, planes, 3, 3), conv_b(ks[7], planes, planes * 9)
    g2, be2, m2, v2 = bn_p(ks[8], ks[9], ks[10], ks[11], planes)
    w3, b3 = conv_w(ks[12], outplanes, planes, 1, 1), conv_b(ks[13], outplanes, planes)
    g3, be3, m3, v3 = bn_p(ks[14], ks[15], ks[16], ks[17], outplanes)
    return dict(w1=w1, b1=b1, g1=g1, be1=be1, m1=m1, v1=v1,
                w2=w2, b2=b2, g2=g2, be2=be2, m2=m2, v2=v2,
                w3=w3, b3=b3, g3=g3, be3=be3, m3=m3, v3=v3)


def bottleneck_reference(x, params, eps=1e-3):
    """Pure-JAX NHWC reference mirroring the kernel's bf16-operand numerics."""
    def conv(z, w_oihw, b, padding):
        w = jnp.transpose(w_oihw, (2, 3, 1, 0)).astype(jnp.bfloat16)  # HWIO
        y = jax.lax.conv_general_dilated(
            z.astype(jnp.bfloat16), w, window_strides=(1, 1), padding=padding,
            dimension_numbers=("NHWC", "HWIO", "NHWC"),
            preferred_element_type=jnp.float32)
        return y + b

    def bn(y, g, beta, m, v):
        return g * (y - m) / jnp.sqrt(v + eps) + beta

    p = params
    h = jax.nn.relu(bn(conv(x, p["w1"], p["b1"], [(0, 0), (0, 0)]),
                       p["g1"], p["be1"], p["m1"], p["v1"]))
    h = jax.nn.relu(bn(conv(h, p["w2"], p["b2"], [(1, 1), (1, 1)]),
                       p["g2"], p["be2"], p["m2"], p["v2"]))
    h = bn(conv(h, p["w3"], p["b3"], [(0, 0), (0, 0)]),
           p["g3"], p["be3"], p["m3"], p["v3"])
    return jax.nn.relu(h + x)


# --------------------------------------------------------------------------
if __name__ == "__main__":
    B, H, W = 2, 16, 16
    planes = 32
    inplanes = planes * 4            # identity residual (downsample=None)

    key = jax.random.PRNGKey(0)
    kx, kp = jax.random.split(key)
    x = jax.random.normal(kx, (B, H, W, inplanes), jnp.float32)
    params = init_params(kp, inplanes, planes)

    out = bottleneck_forward(x, params)
    out = jax.block_until_ready(out)

    ref = bottleneck_reference(x, params)
    assert out.shape == ref.shape == (B, H, W, planes * 4)
    assert jnp.allclose(out, ref, atol=1e-2, rtol=1e-2), "mismatch vs reference"

    print("KERNEL_OK")
</pallas_src>

<mosaic_0001>
module attributes {stable_mosaic.version = 11 : i64} {
  func.func @bottleneck_kernel(%arg0: i32, %arg1: memref<1x16x16x128xf32, #tpu.memory_space<vmem>>, %arg2: memref<128x32xbf16, #tpu.memory_space<vmem>>, %arg3: memref<1x32xf32, #tpu.memory_space<vmem>>, %arg4: memref<1x32xf32, #tpu.memory_space<vmem>>, %arg5: memref<9x32x32xbf16, #tpu.memory_space<vmem>>, %arg6: memref<1x32xf32, #tpu.memory_space<vmem>>, %arg7: memref<1x32xf32, #tpu.memory_space<vmem>>, %arg8: memref<32x128xbf16, #tpu.memory_space<vmem>>, %arg9: memref<1x128xf32, #tpu.memory_space<vmem>>, %arg10: memref<1x128xf32, #tpu.memory_space<vmem>>, %arg11: memref<1x16x16x128xf32, #tpu.memory_space<vmem>>, %arg12: memref<18x18x32xf32, #tpu.memory_space<vmem>>) attributes {dimension_semantics = [#tpu.dimension_semantics<parallel>], iteration_bounds = array<i64: 2>, scalar_prefetch = 0 : i64, scratch_operands = 1 : i64, tpu.core_type = #tpu.core_type<tc>, window_params = [{transform_indices = @transform_0, window_bounds = array<i64: 1, 16, 16, 128>}, {pipeline_mode = #tpu.pipeline_mode<synchronous>, transform_indices = @transform_1, window_bounds = array<i64: 128, 32>}, {pipeline_mode = #tpu.pipeline_mode<synchronous>, transform_indices = @transform_2, window_bounds = array<i64: 1, 32>}, {pipeline_mode = #tpu.pipeline_mode<synchronous>, transform_indices = @transform_3, window_bounds = array<i64: 1, 32>}, {pipeline_mode = #tpu.pipeline_mode<synchronous>, transform_indices = @transform_4, window_bounds = array<i64: 9, 32, 32>}, {pipeline_mode = #tpu.pipeline_mode<synchronous>, transform_indices = @transform_5, window_bounds = array<i64: 1, 32>}, {pipeline_mode = #tpu.pipeline_mode<synchronous>, transform_indices = @transform_6, window_bounds = array<i64: 1, 32>}, {pipeline_mode = #tpu.pipeline_mode<synchronous>, transform_indices = @transform_7, window_bounds = array<i64: 32, 128>}, {pipeline_mode = #tpu.pipeline_mode<synchronous>, transform_indices = @transform_8, window_bounds = array<i64: 1, 128>}, {pipeline_mode = #tpu.pipeline_mode<synchronous>, transform_indices = @transform_9, window_bounds = array<i64: 1, 128>}, {transform_indices = @transform_10, window_bounds = array<i64: 1, 16, 16, 128>}]} {
    %c0 = arith.constant 0 : index
    %c0_0 = arith.constant 0 : index
    %c0_1 = arith.constant 0 : index
    %c0_2 = arith.constant 0 : index
    %0 = vector.load %arg1[%c0, %c0_0, %c0_1, %c0_2] : memref<1x16x16x128xf32, #tpu.memory_space<vmem>>, vector<1x16x16x128xf32>
    %1 = vector.shape_cast %0 : vector<1x16x16x128xf32> to vector<16x16x128xf32>
    %2 = vector.shape_cast %1 : vector<16x16x128xf32> to vector<256x128xf32>
    %3 = arith.truncf %2 : vector<256x128xf32> to vector<256x128xbf16>
    %c0_3 = arith.constant 0 : index
    %c0_4 = arith.constant 0 : index
    %4 = vector.load %arg2[%c0_3, %c0_4] : memref<128x32xbf16, #tpu.memory_space<vmem>>, vector<128x32xbf16>
    %cst = arith.constant dense<0.000000e+00> : vector<256x32xf32>
    %5 = tpu.matmul %3, %4, %cst {dimension_numbers = #tpu.dot_dimension_numbers<[1], [0], [0], [1], [0, 0, 1, 1], [], []>} : vector<256x128xbf16>, vector<128x32xbf16>, vector<256x32xf32> -> vector<256x32xf32>
    %c0_5 = arith.constant 0 : index
    %c0_6 = arith.constant 0 : index
    %6 = vector.load %arg3[%c0_5, %c0_6] : memref<1x32xf32, #tpu.memory_space<vmem>>, vector<1x32xf32>
    %7 = vector.broadcast %6 : vector<1x32xf32> to vector<256x32xf32>
    %8 = arith.mulf %5, %7 : vector<256x32xf32>
    %c0_7 = arith.constant 0 : index
    %c0_8 = arith.constant 0 : index
    %9 = vector.load %arg4[%c0_7, %c0_8] : memref<1x32xf32, #tpu.memory_space<vmem>>, vector<1x32xf32>
    %10 = vector.broadcast %9 : vector<1x32xf32> to vector<256x32xf32>
    %11 = arith.addf %8, %10 : vector<256x32xf32>
    %cst_9 = arith.constant 0.000000e+00 : f32
    %12 = vector.broadcast %cst_9 : f32 to vector<256x32xf32>
    %13 = arith.maximumf %11, %12 : vector<256x32xf32>
    %cst_10 = arith.constant 0.000000e+00 : f32
    %14 = vector.broadcast %cst_10 : f32 to vector<18x18x32xf32>
    %c0_11 = arith.constant 0 : index
    %c0_12 = arith.constant 0 : index
    %c0_13 = arith.constant 0 : index
    %15 = vector.load %arg12[%c0_11, %c0_12, %c0_13] : memref<18x18x32xf32, #tpu.memory_space<vmem>>, vector<18x18x32xf32>
    tpu.vector_store %arg12[%c0_11, %c0_12, %c0_13], %14 {strides = array<i32>} : memref<18x18x32xf32, #tpu.memory_space<vmem>>, vector<18x18x32xf32>,
    %16 = vector.shape_cast %13 : vector<256x32xf32> to vector<16x16x32xf32>
    %c1 = arith.constant 1 : index
    %c1_14 = arith.constant 1 : index
    %c0_15 = arith.constant 0 : index
    %17 = vector.load %arg12[%c1, %c1_14, %c0_15] : memref<18x18x32xf32, #tpu.memory_space<vmem>>, vector<16x16x32xf32>
    tpu.vector_store %arg12[%c1, %c1_14, %c0_15], %16 {strides = array<i32>} : memref<18x18x32xf32, #tpu.memory_space<vmem>>, vector<16x16x32xf32>,
    %cst_16 = arith.constant 0.000000e+00 : f32
    %18 = vector.broadcast %cst_16 : f32 to vector<256x32xf32>
    %c0_17 = arith.constant 0 : index
    %c0_18 = arith.constant 0 : index
    %c0_19 = arith.constant 0 : index
    %19 = vector.load %arg12[%c0_17, %c0_18, %c0_19] : memref<18x18x32xf32, #tpu.memory_space<vmem>>, vector<16x16x32xf32>
    %20 = vector.shape_cast %19 : vector<16x16x32xf32> to vector<256x32xf32>
    %21 = arith.truncf %20 : vector<256x32xf32> to vector<256x32xbf16>
    %c0_20 = arith.constant 0 : index
    %c0_21 = arith.constant 0 : index
    %c0_22 = arith.constant 0 : index
    %22 = vector.load %arg5[%c0_20, %c0_21, %c0_22] : memref<9x32x32xbf16, #tpu.memory_space<vmem>>, vector<1x32x32xbf16>
    %23 = vector.shape_cast %22 : vector<1x32x32xbf16> to vector<32x32xbf16>
    %cst_23 = arith.constant dense<0.000000e+00> : vector<256x32xf32>
    %24 = tpu.matmul %21, %23, %cst_23 {dimension_numbers = #tpu.dot_dimension_numbers<[1], [0], [0], [1], [0, 0, 1, 1], [], []>} : vector<256x32xbf16>, vector<32x32xbf16>, vector<256x32xf32> -> vector<256x32xf32>
    %25 = arith.addf %18, %24 : vector<256x32xf32>
    %c0_24 = arith.constant 0 : index
    %c1_25 = arith.constant 1 : index
    %c0_26 = arith.constant 0 : index
    %26 = vector.load %arg12[%c0_24, %c1_25, %c0_26] : memref<18x18x32xf32, #tpu.memory_space<vmem>>, vector<16x16x32xf32>
    %27 = vector.shape_cast %26 : vector<16x16x32xf32> to vector<256x32xf32>
    %28 = arith.truncf %27 : vector<256x32xf32> to vector<256x32xbf16>
    %c1_27 = arith.constant 1 : index
    %c0_28 = arith.constant 0 : index
    %c0_29 = arith.constant 0 : index
    %29 = vector.load %arg5[%c1_27, %c0_28, %c0_29] : memref<9x32x32xbf16, #tpu.memory_space<vmem>>, vector<1x32x32xbf16>
    %30 = vector.shape_cast %29 : vector<1x32x32xbf16> to vector<32x32xbf16>
    %cst_30 = arith.constant dense<0.000000e+00> : vector<256x32xf32>
    %31 = tpu.matmul %28, %30, %cst_30 {dimension_numbers = #tpu.dot_dimension_numbers<[1], [0], [0], [1], [0, 0, 1, 1], [], []>} : vector<256x32xbf16>, vector<32x32xbf16>, vector<256x32xf32> -> vector<256x32xf32>
    %32 = arith.addf %25, %31 : vector<256x32xf32>
    %c0_31 = arith.constant 0 : index
    %c2 = arith.constant 2 : index
    %c0_32 = arith.constant 0 : index
    %33 = vector.load %arg12[%c0_31, %c2, %c0_32] : memref<18x18x32xf32, #tpu.memory_space<vmem>>, vector<16x16x32xf32>
    %34 = vector.shape_cast %33 : vector<16x16x32xf32> to vector<256x32xf32>
    %35 = arith.truncf %34 : vector<256x32xf32> to vector<256x32xbf16>
    %c2_33 = arith.constant 2 : index
    %c0_34 = arith.constant 0 : index
    %c0_35 = arith.constant 0 : index
    %36 = vector.load %arg5[%c2_33, %c0_34, %c0_35] : memref<9x32x32xbf16, #tpu.memory_space<vmem>>, vector<1x32x32xbf16>
    %37 = vector.shape_cast %36 : vector<1x32x32xbf16> to vector<32x32xbf16>
    %cst_36 = arith.constant dense<0.000000e+00> : vector<256x32xf32>
    %38 = tpu.matmul %35, %37, %cst_36 {dimension_numbers = #tpu.dot_dimension_numbers<[1], [0], [0], [1], [0, 0, 1, 1], [], []>} : vector<256x32xbf16>, vector<32x32xbf16>, vector<256x32xf32> -> vector<256x32xf32>
    %39 = arith.addf %32, %38 : vector<256x32xf32>
    %c1_37 = arith.constant 1 : index
    %c0_38 = arith.constant 0 : index
    %c0_39 = arith.constant 0 : index
    %40 = vector.load %arg12[%c1_37, %c0_38, %c0_39] : memref<18x18x32xf32, #tpu.memory_space<vmem>>, vector<16x16x32xf32>
    %41 = vector.shape_cast %40 : vector<16x16x32xf32> to vector<256x32xf32>
    %42 = arith.truncf %41 : vector<256x32xf32> to vector<256x32xbf16>
    %c3 = arith.constant 3 : index
    %c0_40 = arith.constant 0 : index
    %c0_41 = arith.constant 0 : index
    %43 = vector.load %arg5[%c3, %c0_40, %c0_41] : memref<9x32x32xbf16, #tpu.memory_space<vmem>>, vector<1x32x32xbf16>
    %44 = vector.shape_cast %43 : vector<1x32x32xbf16> to vector<32x32xbf16>
    %cst_42 = arith.constant dense<0.000000e+00> : vector<256x32xf32>
    %45 = tpu.matmul %42, %44, %cst_42 {dimension_numbers = #tpu.dot_dimension_numbers<[1], [0], [0], [1], [0, 0, 1, 1], [], []>} : vector<256x32xbf16>, vector<32x32xbf16>, vector<256x32xf32> -> vector<256x32xf32>
    %46 = arith.addf %39, %45 : vector<256x32xf32>
    %c1_43 = arith.constant 1 : index
    %c1_44 = arith.constant 1 : index
    %c0_45 = arith.constant 0 : index
    %47 = vector.load %arg12[%c1_43, %c1_44, %c0_45] : memref<18x18x32xf32, #tpu.memory_space<vmem>>, vector<16x16x32xf32>
    %48 = vector.shape_cast %47 : vector<16x16x32xf32> to vector<256x32xf32>
    %49 = arith.truncf %48 : vector<256x32xf32> to vector<256x32xbf16>
    %c4 = arith.constant 4 : index
    %c0_46 = arith.constant 0 : index
    %c0_47 = arith.constant 0 : index
    %50 = vector.load %arg5[%c4, %c0_46, %c0_47] : memref<9x32x32xbf16, #tpu.memory_space<vmem>>, vector<1x32x32xbf16>
    %51 = vector.shape_cast %50 : vector<1x32x32xbf16> to vector<32x32xbf16>
    %cst_48 = arith.constant dense<0.000000e+00> : vector<256x32xf32>
    %52 = tpu.matmul %49, %51, %cst_48 {dimension_numbers = #tpu.dot_dimension_numbers<[1], [0], [0], [1], [0, 0, 1, 1], [], []>} : vector<256x32xbf16>, vector<32x32xbf16>, vector<256x32xf32> -> vector<256x32xf32>
    %53 = arith.addf %46, %52 : vector<256x32xf32>
    %c1_49 = arith.constant 1 : index
    %c2_50 = arith.constant 2 : index
    %c0_51 = arith.constant 0 : index
    %54 = vector.load %arg12[%c1_49, %c2_50, %c0_51] : memref<18x18x32xf32, #tpu.memory_space<vmem>>, vector<16x16x32xf32>
    %55 = vector.shape_cast %54 : vector<16x16x32xf32> to vector<256x32xf32>
    %56 = arith.truncf %55 : vector<256x32xf32> to vector<256x32xbf16>
    %c5 = arith.constant 5 : index
    %c0_52 = arith.constant 0 : index
    %c0_53 = arith.constant 0 : index
    %57 = vector.load %arg5[%c5, %c0_52, %c0_53] : memref<9x32x32xbf16, #tpu.memory_space<vmem>>, vector<1x32x32xbf16>
    %58 = vector.shape_cast %57 : vector<1x32x32xbf16> to vector<32x32xbf16>
    %cst_54 = arith.constant dense<0.000000e+00> : vector<256x32xf32>
    %59 = tpu.matmul %56, %58, %cst_54 {dimension_numbers = #tpu.dot_dimension_numbers<[1], [0], [0], [1], [0, 0, 1, 1], [], []>} : vector<256x32xbf16>, vector<32x32xbf16>, vector<256x32xf32> -> vector<256x32xf32>
    %60 = arith.addf %53, %59 : vector<256x32xf32>
    %c2_55 = arith.constant 2 : index
    %c0_56 = arith.constant 0 : index
    %c0_57 = arith.constant 0 : index
    %61 = vector.load %arg12[%c2_55, %c0_56, %c0_57] : memref<18x18x32xf32, #tpu.memory_space<vmem>>, vector<16x16x32xf32>
    %62 = vector.shape_cast %61 : vector<16x16x32xf32> to vector<256x32xf32>
    %63 = arith.truncf %62 : vector<256x32xf32> to vector<256x32xbf16>
    %c6 = arith.constant 6 : index
    %c0_58 = arith.constant 0 : index
    %c0_59 = arith.constant 0 : index
    %64 = vector.load %arg5[%c6, %c0_58, %c0_59] : memref<9x32x32xbf16, #tpu.memory_space<vmem>>, vector<1x32x32xbf16>
    %65 = vector.shape_cast %64 : vector<1x32x32xbf16> to vector<32x32xbf16>
    %cst_60 = arith.constant dense<0.000000e+00> : vector<256x32xf32>
    %66 = tpu.matmul %63, %65, %cst_60 {dimension_numbers = #tpu.dot_dimension_numbers<[1], [0], [0], [1], [0, 0, 1, 1], [], []>} : vector<256x32xbf16>, vector<32x32xbf16>, vector<256x32xf32> -> vector<256x32xf32>
    %67 = arith.addf %60, %66 : vector<256x32xf32>
    %c2_61 = arith.constant 2 : index
    %c1_62 = arith.constant 1 : index
    %c0_63 = arith.constant 0 : index
    %68 = vector.load %arg12[%c2_61, %c1_62, %c0_63] : memref<18x18x32xf32, #tpu.memory_space<vmem>>, vector<16x16x32xf32>
    %69 = vector.shape_cast %68 : vector<16x16x32xf32> to vector<256x32xf32>
    %70 = arith.truncf %69 : vector<256x32xf32> to vector<256x32xbf16>
    %c7 = arith.constant 7 : index
    %c0_64 = arith.constant 0 : index
    %c0_65 = arith.constant 0 : index
    %71 = vector.load %arg5[%c7, %c0_64, %c0_65] : memref<9x32x32xbf16, #tpu.memory_space<vmem>>, vector<1x32x32xbf16>
    %72 = vector.shape_cast %71 : vector<1x32x32xbf16> to vector<32x32xbf16>
    %cst_66 = arith.constant dense<0.000000e+00> : vector<256x32xf32>
    %73 = tpu.matmul %70, %72, %cst_66 {dimension_numbers = #tpu.dot_dimension_numbers<[1], [0], [0], [1], [0, 0, 1, 1], [], []>} : vector<256x32xbf16>, vector<32x32xbf16>, vector<256x32xf32> -> vector<256x32xf32>
    %74 = arith.addf %67, %73 : vector<256x32xf32>
    %c2_67 = arith.constant 2 : index
    %c2_68 = arith.constant 2 : index
    %c0_69 = arith.constant 0 : index
    %75 = vector.load %arg12[%c2_67, %c2_68, %c0_69] : memref<18x18x32xf32, #tpu.memory_space<vmem>>, vector<16x16x32xf32>
    %76 = vector.shape_cast %75 : vector<16x16x32xf32> to vector<256x32xf32>
    %77 = arith.truncf %76 : vector<256x32xf32> to vector<256x32xbf16>
    %c8 = arith.constant 8 : index
    %c0_70 = arith.constant 0 : index
    %c0_71 = arith.constant 0 : index
    %78 = vector.load %arg5[%c8, %c0_70, %c0_71] : memref<9x32x32xbf16, #tpu.memory_space<vmem>>, vector<1x32x32xbf16>
    %79 = vector.shape_cast %78 : vector<1x32x32xbf16> to vector<32x32xbf16>
    %cst_72 = arith.constant dense<0.000000e+00> : vector<256x32xf32>
    %80 = tpu.matmul %77, %79, %cst_72 {dimension_numbers = #tpu.dot_dimension_numbers<[1], [0], [0], [1], [0, 0, 1, 1], [], []>} : vector<256x32xbf16>, vector<32x32xbf16>, vector<256x32xf32> -> vector<256x32xf32>
    %81 = arith.addf %74, %80 : vector<256x32xf32>
    %c0_73 = arith.constant 0 : index
    %c0_74 = arith.constant 0 : index
    %82 = vector.load %arg6[%c0_73, %c0_74] : memref<1x32xf32, #tpu.memory_space<vmem>>, vector<1x32xf32>
    %83 = vector.broadcast %82 : vector<1x32xf32> to vector<256x32xf32>
    %84 = arith.mulf %81, %83 : vector<256x32xf32>
    %c0_75 = arith.constant 0 : index
    %c0_76 = arith.constant 0 : index
    %85 = vector.load %arg7[%c0_75, %c0_76] : memref<1x32xf32, #tpu.memory_space<vmem>>, vector<1x32xf32>
    %86 = vector.broadcast %85 : vector<1x32xf32> to vector<256x32xf32>
    %87 = arith.addf %84, %86 : vector<256x32xf32>
    %cst_77 = arith.constant 0.000000e+00 : f32
    %88 = vector.broadcast %cst_77 : f32 to vector<256x32xf32>
    %89 = arith.maximumf %87, %88 : vector<256x32xf32>
    %90 = arith.truncf %89 : vector<256x32xf32> to vector<256x32xbf16>
    %c0_78 = arith.constant 0 : index
    %c0_79 = arith.constant 0 : index
    %91 = vector.load %arg8[%c0_78, %c0_79] : memref<32x128xbf16, #tpu.memory_space<vmem>>, vector<32x128xbf16>
    %cst_80 = arith.constant dense<0.000000e+00> : vector<256x128xf32>
    %92 = tpu.matmul %90, %91, %cst_80 {dimension_numbers = #tpu.dot_dimension_numbers<[1], [0], [0], [1], [0, 0, 1, 1], [], []>} : vector<256x32xbf16>, vector<32x128xbf16>, vector<256x128xf32> -> vector<256x128xf32>
    %c0_81 = arith.constant 0 : index
    %c0_82 = arith.constant 0 : index
    %93 = vector.load %arg9[%c0_81, %c0_82] : memref<1x128xf32, #tpu.memory_space<vmem>>, vector<1x128xf32>
    %94 = vector.broadcast %93 : vector<1x128xf32> to vector<256x128xf32>
    %95 = arith.mulf %92, %94 : vector<256x128xf32>
    %c0_83 = arith.constant 0 : index
    %c0_84 = arith.constant 0 : index
    %96 = vector.load %arg10[%c0_83, %c0_84] : memref<1x128xf32, #tpu.memory_space<vmem>>, vector<1x128xf32>
    %97 = vector.broadcast %96 : vector<1x128xf32> to vector<256x128xf32>
    %98 = arith.addf %95, %97 : vector<256x128xf32>
    %99 = arith.addf %98, %2 : vector<256x128xf32>
    %cst_85 = arith.constant 0.000000e+00 : f32
    %100 = vector.broadcast %cst_85 : f32 to vector<256x128xf32>
    %101 = arith.maximumf %99, %100 : vector<256x128xf32>
    %102 = vector.shape_cast %101 : vector<256x128xf32> to vector<16x16x128xf32>
    %c0_86 = arith.constant 0 : index
    %c0_87 = arith.constant 0 : index
    %c0_88 = arith.constant 0 : index
    %c0_89 = arith.constant 0 : index
    %103 = vector.load %arg11[%c0_86, %c0_87, %c0_88, %c0_89] : memref<1x16x16x128xf32, #tpu.memory_space<vmem>>, vector<1x16x16x128xf32>
    %104 = vector.shape_cast %103 : vector<1x16x16x128xf32> to vector<16x16x128xf32>
    %105 = vector.shape_cast %102 : vector<16x16x128xf32> to vector<1x16x16x128xf32>
    tpu.vector_store %arg11[%c0_86, %c0_87, %c0_88, %c0_89], %105 {strides = array<i32>} : memref<1x16x16x128xf32, #tpu.memory_space<vmem>>, vector<1x16x16x128xf32>,
    return
  }
  func.func @transform_0(%arg0: i32) -> (i32, i32, i32, i32) {
    %c0_i32 = arith.constant 0 : i32
    %c0_i32_0 = arith.constant 0 : i32
    %c0_i32_1 = arith.constant 0 : i32
    %c0_i32_2 = arith.constant 0 : i32
    return %arg0, %c0_i32, %c0_i32_0, %c0_i32_1 : i32, i32, i32, i32
  }
  func.func @transform_1(%arg0: i32) -> (i32, i32) {
    %c0_i32 = arith.constant 0 : i32
    %c0_i32_0 = arith.constant 0 : i32
    %c0_i32_1 = arith.constant 0 : i32
    return %c0_i32, %c0_i32_0 : i32, i32
  }
  func.func @transform_2(%arg0: i32) -> (i32, i32) {
    %c0_i32 = arith.constant 0 : i32
    %c0_i32_0 = arith.constant 0 : i32
    %c0_i32_1 = arith.constant 0 : i32
    return %c0_i32, %c0_i32_0 : i32, i32
  }
  func.func @transform_3(%arg0: i32) -> (i32, i32) {
    %c0_i32 = arith.constant 0 : i32
    %c0_i32_0 = arith.constant 0 : i32
    %c0_i32_1 = arith.constant 0 : i32
    return %c0_i32, %c0_i32_0 : i32, i32
  }
  func.func @transform_4(%arg0: i32) -> (i32, i32, i32) {
    %c0_i32 = arith.constant 0 : i32
    %c0_i32_0 = arith.constant 0 : i32
    %c0_i32_1 = arith.constant 0 : i32
    %c0_i32_2 = arith.constant 0 : i32
    return %c0_i32, %c0_i32_0, %c0_i32_1 : i32, i32, i32
  }
  func.func @transform_5(%arg0: i32) -> (i32, i32) {
    %c0_i32 = arith.constant 0 : i32
    %c0_i32_0 = arith.constant 0 : i32
    %c0_i32_1 = arith.constant 0 : i32
    return %c0_i32, %c0_i32_0 : i32, i32
  }
  func.func @transform_6(%arg0: i32) -> (i32, i32) {
    %c0_i32 = arith.constant 0 : i32
    %c0_i32_0 = arith.constant 0 : i32
    %c0_i32_1 = arith.constant 0 : i32
    return %c0_i32, %c0_i32_0 : i32, i32
  }
  func.func @transform_7(%arg0: i32) -> (i32, i32) {
    %c0_i32 = arith.constant 0 : i32
    %c0_i32_0 = arith.constant 0 : i32
    %c0_i32_1 = arith.constant 0 : i32
    return %c0_i32, %c0_i32_0 : i32, i32
  }
  func.func @transform_8(%arg0: i32) -> (i32, i32) {
    %c0_i32 = arith.constant 0 : i32
    %c0_i32_0 = arith.constant 0 : i32
    %c0_i32_1 = arith.constant 0 : i32
    return %c0_i32, %c0_i32_0 : i32, i32
  }
  func.func @transform_9(%arg0: i32) -> (i32, i32) {
    %c0_i32 = arith.constant 0 : i32
    %c0_i32_0 = arith.constant 0 : i32
    %c0_i32_1 = arith.constant 0 : i32
    return %c0_i32, %c0_i32_0 : i32, i32
  }
  func.func @transform_10(%arg0: i32) -> (i32, i32, i32, i32) {
    %c0_i32 = arith.constant 0 : i32
    %c0_i32_0 = arith.constant 0 : i32
    %c0_i32_1 = arith.constant 0 : i32
    %c0_i32_2 = arith.constant 0 : i32
    return %arg0, %c0_i32, %c0_i32_0, %c0_i32_1 : i32, i32, i32, i32
  }
}

</mosaic_0001>

<bundles_post_ra>
// kernel: tpu_custom_call.1
= control target key start
LH: loop header
LB: loop body
LE: loop exit
PB: predicated region body
PF: predicated region fallthrough
CT: control target
= control target key end

     0   :  { %15 = vsyncpa [#allocation4], 0  ;;  %s6712_s0 = inlined_call_operand.hbm [shape: f32[2,16,16,128], index: 0, kind: input, shape index: {}]   ;;  %s6713_s1 = inlined_call_operand.vmem [shape: bf16[128,32], index: 1, kind: input, shape index: {}]   ;;  %s6714_s2 = inlined_call_operand.vmem [shape: f32[1,32], index: 2, kind: input, shape index: {}]   ;;  %s6715_s3 = inlined_call_operand.vmem [shape: f32[1,32], index: 3, kind: input, shape index: {}]   ;;  %s6716_s4 = inlined_call_operand.hbm [shape: bf16[9,32,32], index: 4, kind: input, shape index: {}]   ;;  %s6717_s5 = inlined_call_operand.vmem [shape: f32[1,32], index: 5, kind: input, shape index: {}]   ;;  %s6718_s6 = inlined_call_operand.vmem [shape: f32[1,32], index: 6, kind: input, shape index: {}]   ;;  %s6719_s7 = inlined_call_operand.vmem [shape: bf16[32,128], index: 7, kind: input, shape index: {}]   ;;  %s6720_s8 = inlined_call_operand.vmem [shape: f32[1,128], index: 8, kind: input, shape index: {}]   ;;  %s6721_s9 = inlined_call_operand.vmem [shape: f32[1,128], index: 9, kind: input, shape index: {}]   ;;  %s6722_s10 = inlined_call_operand.hbm [shape: f32[2,16,16,128], index: 10, kind: output, shape index: {}]  }
   0x1   :  { %17 = vsyncpa [#allocation4 + $0x1], 0 }
   0x2   :  { %18 = vsyncpa [#allocation7], 0 }
   0x3   :  { %19 = vsyncpa [#allocation5], 0 }
   0x4   :  { %21 = vsyncpa [#allocation5 + $0x1], 0  ;;  %s5581_s13 = smov 0   ;;  %s5583_s14 = smov 0  }
   0x5   :  { %s5585_s15 = smov 0   ;;  %s5587_s16 = smov 0  }
   0x6 LB: > { %6730 = sst [smem:[#allocation12_spill]] %s5502_s13  ;;  %s5602_s17 = sadd.s32 4294967295, %s5514_s16   ;;  %s5514_s16 = sphi %s5587_s16, %s6748_s16   ;;  %s5510_s15 = sphi %s5585_s15, %s6751_s15   ;;  %s5506_s14 = sphi %s5583_s14, %s6750_s14   ;;  %s5502_s13 = sphi %s5581_s13, %s6749_s13  }
   0x7   : > { %s4178_s18 = sadd.s32 4294967294, %s5514_s16   ;;  %p47_p0 = scmp.ne.s32.totalorder %s5506_s14, %s5502_s13 }
   0x8   : > { %p6725_p1 = scmp.eq.s32.totalorder %s5602_s17, 0  ;;  %p266_p3 = scmp.eq.s32.totalorder %s4178_s18, 1 }
   0x9   : > { %p4179_p5 = scmp.ge.s32.totalorder %s5514_s16, 1  ;;  %p273_p7 = scmp.lt.s32.totalorder %s5514_s16, 3 }
   0xa   : > { %p5611_p4 = por %p6725_p1, %p47_p0  ;;  %p5616_p6 = por %p266_p3, %p47_p0 }
   0xb   : > { %p5621_p8 = pnand %p4179_p5, %p273_p7  ;;  %s5516_s22 = smov [#allocation6]  }
   0xc   : > { %s6731_s19 = scalar_select %p5611_p4, 1, 0 }
   0xd   : > { %s6732_s20 = scalar_select %p5616_p6, 1, 0 }
   0xe   : > { %s6734_s21 = scalar_select %p5621_p8, 1, 0 }
   0xf   : > { %6733 = sst [smem:[#allocation13_spill]] %s6732_s20  ;;  %s294_s23 = sshll.u32 %s5516_s22, 4  ;;  %s5625_s23 = int_to_ptr.vmem [resolvable:$true] %s294_s23 }
  0x10   : > { %p5270_p9 = pneg %p5621_p8  ;;  %s5637_s25 = sadd.s32 1, %s5514_s16  }
  0x11   : > { %6736 = sst [smem:[#allocation14_spill]] %s5637_s25  ;;  %s34_s26 = sadd.s32 1, %s5510_s15 }
  0x12   : > { %p5632_p11 = pnand %p5270_p9, %p6725_p1  ;;  %s31_s27 = ssub.s32 %s5514_s16, %s5637_s25 }
  0x13   : > { %s5386_s30 = scalar_lea.hbm %s6716_s4, 2304 }
  0x14   : > { %p5387_p12 = scmp.ne.s32.totalorder %s6716_s4, %s5386_s30  ;;  %p5388_p13 = pneg %p5632_p11 }
  0x15   : > { %p5393_p5 = scmp.lt.u32.totalorder %s5386_s30, %s6716_s4 }
  0x16   : > { %p5389_p0 = pnand %p5388_p13, %p5387_p12 }
  0x18   : > { %p5390_p3 = pneg %p5389_p0 }
  0x1a   : > { %p5395_p7 = pnand %p5393_p5, %p5390_p3 }
  0x1c   : > { %5398 = shalt.err (!%p5395_p7)
}
  0x1d   : > { %s5399_s25 = scalar_lea.vmem %s5625_s23, 2304  ;;  %p5407_p2 = scmp.lt.s32.totalorder %s5625_s23, %s5625_s23 }
  0x1e   : > { %p5400_p9 = scmp.ne.s32.totalorder %s5625_s23, %s5399_s25  ;;  %p5408_p6 = scmp.lt.s32.totalorder %s5399_s25, %s5399_s25 }
  0x20   : > { %p5402_p10 = pnand %p5400_p9, %p5388_p13  ;;  %p5409_p4 = por %p5408_p6, %p5407_p2 }
  0x22   : > { %p5403_p1 = pneg %p5402_p10 }
  0x24   : > { %p5410_p8 = pnand %p5409_p4, %p5403_p1 }
  0x26   : > { %5413 = shalt.err (!%p5410_p8)
}
  0x27   : > { %s5517_s28 = smov 64   ;;  %s5518_s29 = smov 4  }
  0x28   : > { %5273 = dma.hbm_to_vmem [thread:$0]  (!%p5632_p11), %s6716_s4, 2304, %s5625_s23, [#allocation7], %s5517_s28, %s5517_s28, %s5518_s29  }
  0x29   : > { %p32_p2 = scmp.eq.s32.totalorder %s31_s27, 0  ;;  %p41_p1 = scmp.ne.s32.totalorder %s5510_s15, %s5506_s14 }
  0x2a   : > { %p42_p4 = scmp.eq.s32.totalorder %s5514_s16, 0  ;;  %p5283_p6 = scmp.lt.s32.totalorder %s5514_s16, 2 }
  0x2b   : > { %s5668_s25 = scalar_select %p32_p2, %s5510_s15, %s34_s26  }
  0x2c   : > { %p43_p8 = por %p42_p4, %p41_p1  ;;  %p6737_p10 = scmp.eq.s32.totalorder %s5602_s17, 1 }
  0x2d   : > { %s323_s18 = sand.u32 1, %s5510_s15   ;;  %s4388_s22 = sshll.u32 %s5514_s16, 12 }
  0x2e   : > { %p5672_p12 = por %p6737_p10, %p41_p1  ;;  %s4182_s20 = sshll.u32 %s323_s18, 8 }
  0x2f   : > { %s5681_s30 = scalar_lea.hbm %s6712_s0, %s4388_s22  ;;  %s327_s23 = scalar_lea.vmem [#allocation3], %s4182_s20 }
  0x30   : > { %s334_s26 = sshll.u32 %s327_s23, 4  ;;  %p5683_p11 = pnand %p5283_p6, %p43_p8  ;;  %s5687_s26 = int_to_ptr.vmem [resolvable:$true] %s334_s26 }
  0x31   : > { %s5689_s28 = scalar_lea.sflag [#allocation4], %s323_s18  ;;  %s5414_s29 = scalar_lea.hbm %s5681_s30, 4096 }
  0x32   : > { %p5415_p13 = scmp.ne.s32.totalorder %s5681_s30, %s5414_s29  ;;  %p5416_p0 = pneg %p5683_p11 }
  0x33   : > { %s5419_s11 = scalar_lea.hbm %s6712_s0, 8192  ;;  %p5420_p7 = scmp.lt.u32.totalorder %s5681_s30, %s6712_s0 }
  0x34   : > { %p5417_p3 = pnand %p5416_p0, %p5415_p13  ;;  %p5421_p9 = scmp.lt.u32.totalorder %s5419_s11, %s5414_s29 }
  0x35   : > { %p5423_p1 = scmp.lt.u32.totalorder %s5414_s29, %s5681_s30 }
  0x36   : > { %p5418_p5 = pneg %p5417_p3  ;;  %p5422_p2 = por %p5421_p9, %p5420_p7 }
  0x38   : > { %p5424_p4 = por %p5423_p1, %p5422_p2 }
  0x3a   : > { %p5425_p6 = pnand %p5424_p4, %p5418_p5 }
  0x3c   : > { %5428 = shalt.err (!%p5425_p6)
}
  0x3d   : > { %s5429_s18 = scalar_lea.vmem %s5687_s26, 4096  ;;  %s5519_s23 = smov [#allocation3]  }
  0x3e   : > { %p5430_p8 = scmp.ne.s32.totalorder %s5687_s26, %s5429_s18  ;;  %s5434_s13 = sshll.u32 %s5519_s23, 4  ;;  %s5435_s13 = int_to_ptr.vmem [resolvable:$false] %s5434_s13 }
  0x3f   : > { %s5436_s20 = scalar_lea.vmem %s5435_s13, 8192  ;;  %p5437_p3 = scmp.lt.s32.totalorder %s5687_s26, %s5435_s13 }
  0x40   : > { %p5432_p10 = pnand %p5430_p8, %p5416_p0  ;;  %p5438_p7 = scmp.lt.s32.totalorder %s5436_s20, %s5429_s18 }
  0x42   : > { %p5433_p13 = pneg %p5432_p10  ;;  %p5439_p9 = por %p5438_p7, %p5437_p3 }
  0x44   : > { %p5440_p2 = pnand %p5439_p9, %p5433_p13 }
  0x46   : > { %5443 = shalt.err (!%p5440_p2)
}
  0x47   : > { %s5520_s29 = smov 128   ;;  %s5521_s11 = smov 8  }
  0x48   : > { %5277 = dma.hbm_to_vmem [thread:$0]  (!%p5683_p11), %s5681_s30, 4096, %s5687_s26, %s5689_s28, %s5520_s29, %s5520_s29, %s5521_s11  }
  0x49   : > { %p6740_p0 = scmp.ne.s32.totalorder %s6734_s21, 0 }
  0x4a   : > { %s5720_s22 = sand.u32 (!%p6740_p0), 1, %s5506_s14   ;;  %p6741_p5 = scmp.ne.s32.totalorder (!%p6740_p0), %s6731_s19, 0 }
  0x4b   : > { %346 = sbr.rel (%p6740_p0) target bundleno = 1192 (0x4a8), region = 60  ;;  %s4186_s24 = sshll.u32 (!%p6740_p0), %s5720_s22, 8 }
  0x4c   : > { %s349_s18 = scalar_lea.sflag (!%p6740_p0), [#allocation4], %s5720_s22  ;;  %s5726_s23 = scalar_lea.vmem (!%p6740_p0), [#allocation3], %s4186_s24 }
  0x52   : > { %5489 = dma.done.wait (%p6741_p5), %s349_s18, 4096  }
  0x53   : > { %5491 = vsyncadd (%p6741_p5), %s349_s18, 4294963200  ;;  %p6742_p11 = scmp.eq.s32.totalorder %s5602_s17, 0 }
  0x55   : > { %5493 = dma.done.wait (%p6742_p11), [#allocation7], 2304   ;;  %p6743_p1 = pmov %p6742_p11 }
  0x56   : > { %v5326_v0 = vld [vmem:[%s6713_s1] sm:$0xff]   ;;  %v5327_v1 = vld [vmem:[%s6713_s1 + $0x8] sm:$0xff]   ;;  %v5328_v2 = vld [vmem:[%s6713_s1 + $0x10] sm:$0xff]   ;;  %vm777_vm0 = vcmask 261120   ;;  %v5522_v56 = vmov 0.0   ;;  %vm780_vm1 = vcmask 254976  }
  0x57   : > { %5495 = vsyncadd (%p6743_p1), [#allocation7], 4294964992  ;;  %4594 = vmatprep.subr.bf16.mxu0 %v5326_v0  ;;  %v5329_v3 = vld [vmem:[%s6713_s1 + $0x18] sm:$0xff]   ;;  %v394_v4 = vld [vmem:[%s5726_s23] sm:$0xff]  ;;  %785 = vst.msk [vmem:[#allocation2 + $0x30] sm:$0xff] %vm777_vm0, %v5522_v56  ;;  %s6543_s18 = scalar_lea.vmem [#allocation8], %s4186_s24 }
  0x58   : > { %4595 = vmatpush3.bf16.msra.mxu0 %v5326_v0  ;;  %v395_v5 = vld [vmem:[%s5726_s23 + $0x8] sm:$0xff]  ;;  %v5330_v7 = vld [vmem:[%s6713_s1 + $0x20] sm:$0xff]   ;;  %v5331_v8 = vld [vmem:[%s6713_s1 + $0x28] sm:$0xff]   ;;  %786 = vst.msk [vmem:[#allocation2 + $0x38] sm:$0xff] %vm777_vm0, %v5522_v56  ;;  %s4389_s24 = sshll.u32 %s5602_s17, 12  ;;  %s4095_s21 = sshll.u32 %s6543_s18, 4  ;;  %s6665_s21 = int_to_ptr.vmem [resolvable:$true] %s4095_s21 }
  0x59   : > { %4596 = vmatprep.subr.bf16.mxu0 %v5327_v1  ;;  %v426_v6 = vpack.c.bf16 %v395_v5, %v394_v4  ;;  %v5332_v9 = vld [vmem:[%s6713_s1 + $0x30] sm:$0xff]   ;;  %v5333_v10 = vld [vmem:[%s6713_s1 + $0x38] sm:$0xff]   ;;  %v396_v11 = vld [vmem:[%s5726_s23 + $0x10] sm:$0xff]  ;;  %778 = vst.msk [vmem:[#allocation2] sm:$0xff] %vm777_vm0, %v5522_v56  ;;  %s6663_s27 = scalar_lea.hbm %s6722_s10, %s4389_s24  ;;  %s4082_s17 = scalar_lea.sflag [#allocation5], %s5720_s22 }
  0x5a   : > { %v397_v12 = vld [vmem:[%s5726_s23 + $0x18] sm:$0xff]  ;;  %v398_v13 = vld [vmem:[%s5726_s23 + $0x20] sm:$0xff]  ;;  %v399_v14 = vld [vmem:[%s5726_s23 + $0x28] sm:$0xff]  ;;  %779 = vst.msk [vmem:[#allocation2 + $0x8] sm:$0xff] %vm777_vm0, %v5522_v56  ;;  %s5444_s19 = scalar_lea.vmem %s6665_s21, 4096 }
  0x5b   : > { %4610 = vmatprep.mubr.bf16.mxu0 %v426_v6  ;;  %v427_v15 = vpack.c.bf16 %v397_v12, %v396_v11  ;;  %v428_v16 = vpack.c.bf16 %v399_v14, %v398_v13  ;;  %v400_v17 = vld [vmem:[%s5726_s23 + $0x30] sm:$0xff]  ;;  %v401_v18 = vld [vmem:[%s5726_s23 + $0x38] sm:$0xff]  ;;  %v402_v19 = vld [vmem:[%s5726_s23 + $0x40] sm:$0xff]  ;;  %782 = vst.msk [vmem:[#allocation2 + $0x18] sm:$0xff] %vm777_vm0, %v5522_v56  ;;  %p5445_p4 = scmp.ne.s32.totalorder %s6665_s21, %s5444_s19 }
  0x5c   : > { %4597 = vmatpush3.bf16.msra.mxu0 %v5327_v1  ;;  %v403_v20 = vld [vmem:[%s5726_s23 + $0x48] sm:$0xff]  ;;  %v429_v21 = vpack.c.bf16 %v401_v18, %v400_v17  ;;  %v404_v23 = vld [vmem:[%s5726_s23 + $0x50] sm:$0xff]  ;;  %v405_v24 = vld [vmem:[%s5726_s23 + $0x58] sm:$0xff]  ;;  %783 = vst.msk [vmem:[#allocation2 + $0x20] sm:$0xff] %vm777_vm0, %v5522_v56 }
  0x5d   : > { %4598 = vmatprep.subr.bf16.mxu0 %v5328_v2  ;;  %v430_v22 = vpack.c.bf16 %v403_v20, %v402_v19  ;;  %v406_v25 = vld [vmem:[%s5726_s23 + $0x60] sm:$0xff]  ;;  %v407_v26 = vld [vmem:[%s5726_s23 + $0x68] sm:$0xff]  ;;  %v431_v27 = vpack.c.bf16 %v405_v24, %v404_v23  ;;  %v408_v29 = vld [vmem:[%s5726_s23 + $0x70] sm:$0xff]  ;;  %788 = vst.msk [vmem:[#allocation2 + $0x48] sm:$0xff] %vm777_vm0, %v5522_v56  ;;  %p5446_p6 = pnand %p5445_p4, %p5672_p12 }
  0x5e   : > { %v432_v28 = vpack.c.bf16 %v407_v26, %v406_v25  ;;  %v409_v30 = vld [vmem:[%s5726_s23 + $0x78] sm:$0xff]  ;;  %v410_v31 = vld [vmem:[%s5726_s23 + $0x80] sm:$0xff]  ;;  %v411_v32 = vld [vmem:[%s5726_s23 + $0x88] sm:$0xff]  ;;  %789 = vst.msk [vmem:[#allocation2 + $0x50] sm:$0xff] %vm777_vm0, %v5522_v56 }
  0x5f   : > { %v433_v33 = vpack.c.bf16 %v409_v30, %v408_v29  ;;  %v434_v34 = vpack.c.bf16 %v411_v32, %v410_v31  ;;  %v412_v35 = vld [vmem:[%s5726_s23 + $0x90] sm:$0xff]  ;;  %v413_v36 = vld [vmem:[%s5726_s23 + $0x98] sm:$0xff]  ;;  %v414_v37 = vld [vmem:[%s5726_s23 + $0xa0] sm:$0xff]  ;;  %791 = vst.msk [vmem:[#allocation2 + $0x60] sm:$0xff] %vm777_vm0, %v5522_v56  ;;  %p5447_p8 = pneg %p5446_p6 }
  0x60   : > { %4599 = vmatpush3.bf16.msra.mxu0 %v5328_v2  ;;  %v415_v38 = vld [vmem:[%s5726_s23 + $0xa8] sm:$0xff]  ;;  %v435_v39 = vpack.c.bf16 %v413_v36, %v412_v35  ;;  %v416_v41 = vld [vmem:[%s5726_s23 + $0xb0] sm:$0xff]  ;;  %v417_v42 = vld [vmem:[%s5726_s23 + $0xb8] sm:$0xff]  ;;  %792 = vst.msk [vmem:[#allocation2 + $0x68] sm:$0xff] %vm777_vm0, %v5522_v56 }
  0x61   : > { %4600 = vmatprep.subr.bf16.mxu0 %v5329_v3  ;;  %v436_v40 = vpack.c.bf16 %v415_v38, %v414_v37  ;;  %v418_v43 = vld [vmem:[%s5726_s23 + $0xc0] sm:$0xff]  ;;  %v419_v44 = vld [vmem:[%s5726_s23 + $0xc8] sm:$0xff]  ;;  %v437_v45 = vpack.c.bf16 %v417_v42, %v416_v41  ;;  %v420_v47 = vld [vmem:[%s5726_s23 + $0xd0] sm:$0xff]  ;;  %794 = vst.msk [vmem:[#allocation2 + $0x78] sm:$0xff] %vm777_vm0, %v5522_v56 }
  0x62   : > { %v438_v46 = vpack.c.bf16 %v419_v44, %v418_v43  ;;  %v421_v48 = vld [vmem:[%s5726_s23 + $0xd8] sm:$0xff]  ;;  %v422_v49 = vld [vmem:[%s5726_s23 + $0xe0] sm:$0xff]  ;;  %v423_v50 = vld [vmem:[%s5726_s23 + $0xe8] sm:$0xff]  ;;  %795 = vst.msk [vmem:[#allocation2 + $0x80] sm:$0xff] %vm777_vm0, %v5522_v56 }
  0x63   : > { %v439_v51 = vpack.c.bf16 %v421_v48, %v420_v47  ;;  %v440_v52 = vpack.c.bf16 %v423_v50, %v422_v49  ;;  %v424_v53 = vld [vmem:[%s5726_s23 + $0xf0] sm:$0xff]  ;;  %v425_v54 = vld [vmem:[%s5726_s23 + $0xf8] sm:$0xff]  ;;  %797 = vst.msk [vmem:[#allocation2 + $0x90] sm:$0xff] %vm777_vm0, %v5522_v56  ;;  %798 = vst.msk [vmem:[#allocation2 + $0x98] sm:$0xff] %vm777_vm0, %v5522_v56 }
  0x64   : > { %4601 = vmatpush3.bf16.msra.mxu0 %v5329_v3  ;;  %v441_v55 = vpack.c.bf16 %v425_v54, %v424_v53  ;;  %800 = vst.msk [vmem:[#allocation2 + $0xa8] sm:$0xff] %vm777_vm0, %v5522_v56  ;;  %801 = vst.msk [vmem:[#allocation2 + $0xb0] sm:$0xff] %vm777_vm0, %v5522_v56  ;;  %v5334_v57 = vld [vmem:[#allocation6 + $0x10] sm:$0xff]   ;;  %v5335_v58 = vld [vmem:[#allocation6 + $0x18] sm:$0xff]  }
  0x65   : > { %4602 = vmatprep.subr.bf16.mxu0 %v5330_v7  ;;  %803 = vst.msk [vmem:[#allocation2 + $0xc0] sm:$0xff] %vm777_vm0, %v5522_v56  ;;  %804 = vst.msk [vmem:[#allocation2 + $0xc8] sm:$0xff] %vm777_vm0, %v5522_v56  ;;  %v918_v59 = vld [vmem:[#allocation2 + $0x1] sm:$0xff]  ;;  %v5855_v0 = vld [vmem:[#allocation6 + $0x40] sm:$0xff]  }
  0x66   : > { %806 = vst.msk [vmem:[#allocation2 + $0xd8] sm:$0xff] %vm777_vm0, %v5522_v56  ;;  %807 = vst.msk [vmem:[#allocation2 + $0xe0] sm:$0xff] %vm777_vm0, %v5522_v56  ;;  %v5847_v62 = vld [vmem:[#allocation6 + $0x30] sm:$0xff]   ;;  %v5851_v63 = vld [vmem:[#allocation6 + $0x38] sm:$0xff]  }
  0x67   : > { %809 = vst.msk [vmem:[#allocation2 + $0xf0] sm:$0xff] %vm777_vm0, %v5522_v56  ;;  %810 = vst.msk [vmem:[#allocation2 + $0xf8] sm:$0xff] %vm777_vm0, %v5522_v56  ;;  %5002 = vmatprep.subr.bf16.mxu1 %v5847_v62  ;;  %v5858_v1 = vld [vmem:[#allocation6] sm:$0xff]   ;;  %v5864_v2 = vld [vmem:[%s6714_s2] ss:$0 sm:$0xff] }
  0x68   : > { %4603 = vmatpush3.bf16.msra.mxu0 %v5330_v7  ;;  %812 = vst.msk [vmem:[#allocation2 + $0x108] sm:$0xff] %vm777_vm0, %v5522_v56  ;;  %813 = vst.msk [vmem:[#allocation2 + $0x110] sm:$0xff] %vm777_vm0, %v5522_v56  ;;  %5004 = vmatpush3.bf16.msra.mxu1 %v5847_v62  ;;  %v5869_v4 = vld [vmem:[%s6715_s3] ss:$0 sm:$0xff] }
  0x69   : > { %4604 = vmatprep.subr.bf16.mxu0 %v5331_v8  ;;  %815 = vst.msk [vmem:[#allocation2 + $0x120] sm:$0xff] %vm777_vm0, %v5522_v56  ;;  %816 = vst.msk [vmem:[#allocation2 + $0x128] sm:$0xff] %vm777_vm0, %v5522_v56  ;;  %5003 = vmatprep.subr.bf16.mxu1 %v5851_v63 }
  0x6a   : > { %818 = vst.msk [vmem:[#allocation2 + $0x138] sm:$0xff] %vm777_vm0, %v5522_v56  ;;  %819 = vst.msk [vmem:[#allocation2 + $0x140] sm:$0xff] %vm777_vm0, %v5522_v56 }
  0x6b   : > { %821 = vst.msk [vmem:[#allocation2 + $0x150] sm:$0xff] %vm777_vm0, %v5522_v56  ;;  %822 = vst.msk [vmem:[#allocation2 + $0x158] sm:$0xff] %vm777_vm0, %v5522_v56 }
  0x6c   : > { %4605 = vmatpush3.bf16.msra.mxu0 %v5331_v8  ;;  %824 = vst.msk [vmem:[#allocation2 + $0x168] sm:$0xff] %vm777_vm0, %v5522_v56  ;;  %825 = vst.msk [vmem:[#allocation2 + $0x170] sm:$0xff] %vm777_vm0, %v5522_v56  ;;  %5005 = vmatpush3.bf16.msra.mxu1 %v5851_v63 }
  0x6d   : > { %4606 = vmatprep.subr.bf16.mxu0 %v5332_v9  ;;  %827 = vst.msk [vmem:[#allocation2 + $0x180] sm:$0xff] %vm777_vm0, %v5522_v56  ;;  %828 = vst.msk [vmem:[#allocation2 + $0x188] sm:$0xff] %vm777_vm0, %v5522_v56  ;;  %4786 = vmatprep.subr.bf16.mxu1 %v5855_v0 }
  0x6e   : > { %830 = vst.msk [vmem:[#allocation2 + $0x198] sm:$0xff] %vm777_vm0, %v5522_v56  ;;  %831 = vst.msk [vmem:[#allocation2 + $0x1a0] sm:$0xff] %vm777_vm0, %v5522_v56 }
  0x6f   : > { %787 = vst.msk [vmem:[#allocation2 + $0x40] sm:$0x3] %vm780_vm1, %v5522_v56  ;;  %781 = vst.msk [vmem:[#allocation2 + $0x10] sm:$0x3] %vm780_vm1, %v5522_v56 }
  0x70   : > { %4607 = vmatpush3.bf16.msra.mxu0 %v5332_v9  ;;  %784 = vst.msk [vmem:[#allocation2 + $0x28] sm:$0x3] %vm780_vm1, %v5522_v56  ;;  %790 = vst.msk [vmem:[#allocation2 + $0x58] sm:$0x3] %vm780_vm1, %v5522_v56 }
  0x71   : > { %4608 = vmatprep.subr.bf16.mxu0 %v5333_v10  ;;  %793 = vst.msk [vmem:[#allocation2 + $0x70] sm:$0x3] %vm780_vm1, %v5522_v56  ;;  %796 = vst.msk [vmem:[#allocation2 + $0x88] sm:$0x3] %vm780_vm1, %v5522_v56 }
  0x72   : > { %799 = vst.msk [vmem:[#allocation2 + $0xa0] sm:$0x3] %vm780_vm1, %v5522_v56  ;;  %802 = vst.msk [vmem:[#allocation2 + $0xb8] sm:$0x3] %vm780_vm1, %v5522_v56 }
  0x73   : > { %805 = vst.msk [vmem:[#allocation2 + $0xd0] sm:$0x3] %vm780_vm1, %v5522_v56  ;;  %808 = vst.msk [vmem:[#allocation2 + $0xe8] sm:$0x3] %vm780_vm1, %v5522_v56 }
  0x74   : > { %4609 = vmatpush3.bf16.msra.mxu0 %v5333_v10  ;;  %811 = vst.msk [vmem:[#allocation2 + $0x100] sm:$0x3] %vm780_vm1, %v5522_v56  ;;  %814 = vst.msk [vmem:[#allocation2 + $0x118] sm:$0x3] %vm780_vm1, %v5522_v56 }
  0x75   : > { %817 = vst.msk [vmem:[#allocation2 + $0x130] sm:$0x3] %vm780_vm1, %v5522_v56  ;;  %820 = vst.msk [vmem:[#allocation2 + $0x148] sm:$0x3] %vm780_vm1, %v5522_v56  ;;  %4642 = vmatprep.subr.bf16.mxu0 %v5334_v57 }
  0x76   : > { %823 = vst.msk [vmem:[#allocation2 + $0x160] sm:$0x3] %vm780_vm1, %v5522_v56  ;;  %826 = vst.msk [vmem:[#allocation2 + $0x178] sm:$0x3] %vm780_vm1, %v5522_v56  ;;  %v919_v60 = vld [vmem:[#allocation2 + $0x9] sm:$0xff] }
  0x77   : > { %4611 = vmatmul.mubr.bf16.vlgmr.msra.gmra.mrb[0].mxu0 %v427_v15  ;;  %829 = vst.msk [vmem:[#allocation2 + $0x190] sm:$0x3] %vm780_vm1, %v5522_v56  ;;  %832 = vst.msk [vmem:[#allocation2 + $0x1a8] sm:$0x3] %vm780_vm1, %v5522_v56  ;;  %v950_v61 = vpack.c.bf16 %v919_v60, %v918_v59 }
  0x78   : > { %4614 = vmatprep.mubr.bf16.mxu0 %v428_v16  ;;  %4643 = vmatpush3.bf16.msra.mxu0 %v5334_v57  ;;  %v5912_v57 = vld [vmem:[#allocation6 + $0x20] sm:$0xff]  }
  0x79   : > { %4644 = vmatprep.subr.bf16.mxu0 %v5335_v58 }
  0x7c   : > { %4645 = vmatpush3.bf16.msra.mxu0 %v5335_v58 }
  0x7d   : > { %4678 = vmatprep.subr.bf16.mxu0 %v5858_v1 }
  0x7f   : > { %4615 = vmatmul.mubr.bf16.gmra.mrb[4].mxu0 %v429_v21 }
  0x80   : > { %4618 = vmatprep.mubr.bf16.mxu0 %v430_v22 }
  0x87   : > { %4619 = vmatmul.mubr.bf16.gmra.mrb[8].mxu0 %v431_v27 }
  0x88   : > { %4622 = vmatprep.mubr.bf16.mxu0 %v432_v28 }
  0x8f   : > { %4623 = vmatmul.mubr.bf16.gmra.mrb[12].mxu0 %v433_v33 }
  0x90   : > { %4626 = vmatprep.mubr.bf16.mxu0 %v434_v34 }
  0x97   : > { %4627 = vmatmul.mubr.bf16.gmra.mrb[16].mxu0 %v435_v39 }
  0x98   : > { %4630 = vmatprep.mubr.bf16.mxu0 %v436_v40 }
  0x9f   : > { %4631 = vmatmul.mubr.bf16.gmra.mrb[20].mxu0 %v437_v45 }
  0xa0   : > { %4634 = vmatprep.mubr.bf16.mxu0 %v438_v46  ;;  %v5341_v46 = vld [vmem:[#allocation6 + $0x8] sm:$0xff]  }
  0xa7   : > { %4635 = vmatmul.mubr.bf16.gmra.mrb[24].mxu0 %v439_v51 }
  0xa8   : > { %4638 = vmatprep.mubr.bf16.mxu0 %v440_v52 }
  0xaf   : > { %4639 = vmatmul.mubr.bf16.gmra.mrb[28].mxu0 %v441_v55 }
  0xb0   : > { %4646 = vmatprep.mubr.msk.bf16.mxu0 %vm777_vm0, %v950_v61 }
 0x14a   : > { %v4612_v3 = vpop.f32.mrb[0].mxu0 }
 0x14b   : > { %v676_v5 = vmul.f32 %v4612_v3, %v5864_v2  ;;  %v540_v6 = vpop.f32.mrb[1].mxu0 }
 0x14c   : > { %v674_v7 = vmul.f32 %v5864_v2, %v540_v6  ;;  %v4613_v8 = vpop.f32.mrb[2].mxu0 }
 0x14d   : > { %v715_v9 = vadd.f32 %v5869_v4, %v676_v5  ;;  %v677_v10 = vmul.f32 %v4613_v8, %v5864_v2  ;;  %v543_v11 = vpop.f32.mrb[3].mxu0 }
 0x14e   : > { %v713_v12 = vadd.f32 %v5869_v4, %v674_v7  ;;  %v675_v13 = vmul.f32 %v5864_v2, %v543_v11 }
 0x14f   : > { %v747_v14 = vmax.f32 %v715_v9, 0.0  ;;  %v716_v15 = vadd.f32 %v5869_v4, %v677_v10 }
 0x150   : > { %v745_v16 = vmax.f32 %v713_v12, 0.0  ;;  %v714_v17 = vadd.f32 %v5869_v4, %v675_v13 }
 0x151   : > { %836 = vst.msk [vmem:[#allocation2 + $0x31] sm:$0xff] %vm777_vm0, %v747_v14  ;;  %v748_v18 = vmax.f32 %v716_v15, 0.0 }
 0x152   : > { %834 = vst.msk [vmem:[#allocation2 + $0x19] sm:$0xff] %vm777_vm0, %v745_v16  ;;  %v746_v19 = vmax.f32 %v714_v17, 0.0  ;;  %v4616_v20 = vpop.f32.mrb[4].mxu0 }
 0x153   : > { %837 = vst.msk [vmem:[#allocation2 + $0x39] sm:$0xff] %vm777_vm0, %v748_v18  ;;  %v680_v21 = vmul.f32 %v4616_v20, %v5864_v2  ;;  %v556_v22 = vpop.f32.mrb[5].mxu0 }
 0x154   : > { %835 = vst.msk [vmem:[#allocation2 + $0x21] sm:$0xff] %vm777_vm0, %v746_v19  ;;  %v678_v23 = vmul.f32 %v5864_v2, %v556_v22  ;;  %v4617_v24 = vpop.f32.mrb[6].mxu0 }
 0x155   : > { %v719_v25 = vadd.f32 %v5869_v4, %v680_v21  ;;  %v681_v26 = vmul.f32 %v4617_v24, %v5864_v2  ;;  %v559_v27 = vpop.f32.mrb[7].mxu0 }
 0x156   : > { %v717_v28 = vadd.f32 %v5869_v4, %v678_v23  ;;  %v679_v29 = vmul.f32 %v5864_v2, %v559_v27 }
 0x157   : > { %v751_v30 = vmax.f32 %v719_v25, 0.0  ;;  %v720_v31 = vadd.f32 %v5869_v4, %v681_v26 }
 0x158   : > { %v749_v32 = vmax.f32 %v717_v28, 0.0  ;;  %v718_v33 = vadd.f32 %v5869_v4, %v679_v29  ;;  %v922_v45 = vld [vmem:[#allocation2 + $0x31] sm:$0xff] }
 0x159   : > { %840 = vst.msk [vmem:[#allocation2 + $0x61] sm:$0xff] %vm777_vm0, %v751_v30  ;;  %v752_v34 = vmax.f32 %v720_v31, 0.0  ;;  %v920_v40 = vld [vmem:[#allocation2 + $0x19] sm:$0xff] }
 0x15a   : > { %838 = vst.msk [vmem:[#allocation2 + $0x49] sm:$0xff] %vm777_vm0, %v749_v32  ;;  %v750_v35 = vmax.f32 %v718_v33, 0.0  ;;  %v4620_v36 = vpop.f32.mrb[8].mxu0  ;;  %v923_v37 = vld [vmem:[#allocation2 + $0x39] sm:$0xff] }
 0x15b   : > { %841 = vst.msk [vmem:[#allocation2 + $0x69] sm:$0xff] %vm777_vm0, %v752_v34  ;;  %v684_v38 = vmul.f32 %v4620_v36, %v5864_v2  ;;  %v572_v39 = vpop.f32.mrb[9].mxu0  ;;  %v921_v41 = vld [vmem:[#allocation2 + $0x21] sm:$0xff]  ;;  %v5901_v50 = vpack.c.bf16 %v923_v37, %v922_v45 }
 0x15c   : > { %839 = vst.msk [vmem:[#allocation2 + $0x51] sm:$0xff] %vm777_vm0, %v750_v35  ;;  %v682_v42 = vmul.f32 %v5864_v2, %v572_v39  ;;  %v4621_v43 = vpop.f32.mrb[10].mxu0  ;;  %v5897_v44 = vpack.c.bf16 %v921_v41, %v920_v40 }
 0x15d   : > { %v723_v47 = vadd.f32 %v5869_v4, %v684_v38  ;;  %v685_v48 = vmul.f32 %v4621_v43, %v5864_v2  ;;  %v575_v49 = vpop.f32.mrb[11].mxu0  ;;  %v5339_v43 = vld [vmem:[#allocation6 + $0x48] sm:$0xff]  }
 0x15e   : > { %v721_v51 = vadd.f32 %v5869_v4, %v682_v42  ;;  %v683_v52 = vmul.f32 %v5864_v2, %v575_v49  ;;  %4647 = vmatmul.mubr.msk.bf16.vlgmr.msra.gmra.mrb[32].mxu0 %vm777_vm0, %v5897_v44 }
 0x15f   : > { %v755_v53 = vmax.f32 %v723_v47, 0.0  ;;  %v724_v54 = vadd.f32 %v5869_v4, %v685_v48  ;;  %4650 = vmatprep.mubr.msk.bf16.mxu0 %vm777_vm0, %v5901_v50  ;;  %4679 = vmatpush3.bf16.msra.mxu0 %v5858_v1 }
 0x160   : > { %v753_v55 = vmax.f32 %v721_v51, 0.0  ;;  %v722_v56 = vadd.f32 %v5869_v4, %v683_v52  ;;  %4680 = vmatprep.subr.bf16.mxu0 %v5341_v46  ;;  %v926_v10 = vld [vmem:[#allocation2 + $0x61] sm:$0xff] }
 0x161   : > { %844 = vst.msk [vmem:[#allocation2 + $0x91] sm:$0xff] %vm777_vm0, %v755_v53  ;;  %v756_v58 = vmax.f32 %v724_v54, 0.0  ;;  %v924_v1 = vld [vmem:[#allocation2 + $0x49] sm:$0xff]  ;;  %v5965_v53 = vld [vmem:[#allocation6 + $0x50] sm:$0xff]  }
 0x162   : > { %842 = vst.msk [vmem:[#allocation2 + $0x79] sm:$0xff] %vm777_vm0, %v753_v55  ;;  %v754_v59 = vmax.f32 %v722_v56, 0.0  ;;  %v4624_v60 = vpop.f32.mrb[12].mxu0  ;;  %v927_v61 = vld [vmem:[#allocation2 + $0x69] sm:$0xff] }
 0x163   : > { %845 = vst.msk [vmem:[#allocation2 + $0x99] sm:$0xff] %vm777_vm0, %v756_v58  ;;  %v688_v3 = vmul.f32 %v4624_v60, %v5864_v2  ;;  %v588_v5 = vpop.f32.mrb[13].mxu0  ;;  %v925_v6 = vld [vmem:[#allocation2 + $0x51] sm:$0xff]  ;;  %4681 = vmatpush3.bf16.msra.mxu0 %v5341_v46  ;;  %v5925_v14 = vpack.c.bf16 %v927_v61, %v926_v10 }
 0x164   : > { %843 = vst.msk [vmem:[#allocation2 + $0x81] sm:$0xff] %vm777_vm0, %v754_v59  ;;  %v686_v7 = vmul.f32 %v5864_v2, %v588_v5  ;;  %v4625_v8 = vpop.f32.mrb[14].mxu0  ;;  %v5920_v9 = vpack.c.bf16 %v925_v6, %v924_v1  ;;  %4714 = vmatprep.subr.bf16.mxu0 %v5912_v57 }
 0x165   : > { %v727_v11 = vadd.f32 %v5869_v4, %v688_v3  ;;  %v689_v12 = vmul.f32 %v4625_v8, %v5864_v2  ;;  %v591_v13 = vpop.f32.mrb[15].mxu0 }
 0x166   : > { %v725_v15 = vadd.f32 %v5869_v4, %v686_v7  ;;  %v687_v16 = vmul.f32 %v5864_v2, %v591_v13  ;;  %4651 = vmatmul.mubr.msk.bf16.gmra.mrb[36].mxu0 %vm777_vm0, %v5920_v9 }
 0x167   : > { %v759_v17 = vmax.f32 %v727_v11, 0.0  ;;  %v728_v18 = vadd.f32 %v5869_v4, %v689_v12  ;;  %4654 = vmatprep.mubr.msk.bf16.mxu0 %vm777_vm0, %v5925_v14 }
 0x168   : > { %v757_v19 = vmax.f32 %v725_v15, 0.0  ;;  %v726_v20 = vadd.f32 %v5869_v4, %v687_v16  ;;  %v930_v36 = vld [vmem:[#allocation2 + $0x91] sm:$0xff] }
 0x169   : > { %848 = vst.msk [vmem:[#allocation2 + $0xc1] sm:$0xff] %vm777_vm0, %v759_v17  ;;  %v760_v21 = vmax.f32 %v728_v18, 0.0  ;;  %v928_v24 = vld [vmem:[#allocation2 + $0x79] sm:$0xff]  ;;  %v1729_v37 = vld [vmem:[#allocation2 + $0x90] sm:$0xff] }
 0x16a   : > { %846 = vst.msk [vmem:[#allocation2 + $0xa9] sm:$0xff] %vm777_vm0, %v757_v19  ;;  %v758_v22 = vmax.f32 %v726_v20, 0.0  ;;  %v4628_v23 = vpop.f32.mrb[16].mxu0  ;;  %v931_v25 = vld [vmem:[#allocation2 + $0x99] sm:$0xff] }
 0x16b   : > { %v1730_v26 = vld [vmem:[#allocation2 + $0x98] sm:$0xff]  ;;  %849 = vst.msk [vmem:[#allocation2 + $0xc9] sm:$0xff] %vm777_vm0, %v760_v21  ;;  %v692_v27 = vmul.f32 %v4628_v23, %v5864_v2  ;;  %v604_v28 = vpop.f32.mrb[17].mxu0  ;;  %v929_v29 = vld [vmem:[#allocation2 + $0x81] sm:$0xff]  ;;  %v5947_v41 = vpack.c.bf16 %v931_v25, %v930_v36 }
 0x16c   : > { %v1727_v30 = vld [vmem:[#allocation2 + $0x78] sm:$0xff]  ;;  %v1728_v31 = vld [vmem:[#allocation2 + $0x80] sm:$0xff]  ;;  %847 = vst.msk [vmem:[#allocation2 + $0xb1] sm:$0xff] %vm777_vm0, %v758_v22  ;;  %v690_v32 = vmul.f32 %v5864_v2, %v604_v28  ;;  %v4629_v33 = vpop.f32.mrb[18].mxu0  ;;  %v5941_v34 = vpack.c.bf16 %v929_v29, %v928_v24  ;;  %v5949_v42 = vpack.c.bf16 %v1730_v26, %v1729_v37 }
 0x16d   : > { %v5943_v35 = vpack.c.bf16 %v1728_v31, %v1727_v30  ;;  %v731_v38 = vadd.f32 %v5869_v4, %v692_v27  ;;  %v693_v39 = vmul.f32 %v4629_v33, %v5864_v2  ;;  %v607_v40 = vpop.f32.mrb[19].mxu0 }
 0x16e   : > { %v729_v45 = vadd.f32 %v5869_v4, %v690_v32  ;;  %v691_v46 = vmul.f32 %v5864_v2, %v607_v40  ;;  %4655 = vmatmul.mubr.msk.bf16.gmra.mrb[40].mxu0 %vm777_vm0, %v5941_v34 }
 0x16f   : > { %4762 = vmatprep.mubr.msk.bf16.mxu1 %vm777_vm0, %v5943_v35  ;;  %v763_v47 = vmax.f32 %v731_v38, 0.0  ;;  %v732_v48 = vadd.f32 %v5869_v4, %v693_v39  ;;  %4658 = vmatprep.mubr.msk.bf16.mxu0 %vm777_vm0, %v5947_v41 }
 0x170   : > { %4763 = vmatmul.mubr.msk.bf16.vlgmr.msra.gmra.mrb[0].mxu1 %vm777_vm0, %v5949_v42  ;;  %v761_v49 = vmax.f32 %v729_v45, 0.0  ;;  %v730_v51 = vadd.f32 %v5869_v4, %v691_v46  ;;  %v934_v10 = vld [vmem:[#allocation2 + $0xc1] sm:$0xff] }
 0x171   : > { %4787 = vmatpush3.bf16.msra.mxu1 %v5855_v0  ;;  %852 = vst.msk [vmem:[#allocation2 + $0xf1] sm:$0xff] %vm777_vm0, %v763_v47  ;;  %v764_v52 = vmax.f32 %v732_v48, 0.0  ;;  %v932_v56 = vld [vmem:[#allocation2 + $0xa9] sm:$0xff]  ;;  %v1733_v11 = vld [vmem:[#allocation2 + $0xc0] sm:$0xff] }
 0x172   : > { %4788 = vmatprep.subr.bf16.mxu1 %v5339_v43  ;;  %850 = vst.msk [vmem:[#allocation2 + $0xd9] sm:$0xff] %vm777_vm0, %v761_v49  ;;  %v762_v54 = vmax.f32 %v730_v51, 0.0  ;;  %v4632_v55 = vpop.f32.mrb[20].mxu0  ;;  %v935_v58 = vld [vmem:[#allocation2 + $0xc9] sm:$0xff] }
 0x173   : > { %v1734_v59 = vld [vmem:[#allocation2 + $0xc8] sm:$0xff]  ;;  %853 = vst.msk [vmem:[#allocation2 + $0xf9] sm:$0xff] %vm777_vm0, %v764_v52  ;;  %v696_v60 = vmul.f32 %v4632_v55, %v5864_v2  ;;  %v620_v61 = vpop.f32.mrb[21].mxu0  ;;  %v933_v3 = vld [vmem:[#allocation2 + $0xb1] sm:$0xff]  ;;  %v5978_v16 = vpack.c.bf16 %v935_v58, %v934_v10 }
 0x174   : > { %v1731_v0 = vld [vmem:[#allocation2 + $0xa8] sm:$0xff]  ;;  %v1732_v5 = vld [vmem:[#allocation2 + $0xb0] sm:$0xff]  ;;  %851 = vst.msk [vmem:[#allocation2 + $0xe1] sm:$0xff] %vm777_vm0, %v762_v54  ;;  %v694_v1 = vmul.f32 %v5864_v2, %v620_v61  ;;  %v4633_v6 = vpop.f32.mrb[22].mxu0  ;;  %v5972_v7 = vpack.c.bf16 %v933_v3, %v932_v56  ;;  %v5980_v17 = vpack.c.bf16 %v1734_v59, %v1733_v11 }
 0x175   : > { %v5974_v8 = vpack.c.bf16 %v1732_v5, %v1731_v0  ;;  %4789 = vmatpush3.bf16.msra.mxu1 %v5339_v43  ;;  %v735_v12 = vadd.f32 %v5869_v4, %v696_v60  ;;  %v697_v13 = vmul.f32 %v4633_v6, %v5864_v2  ;;  %v623_v15 = vpop.f32.mrb[23].mxu0 }
 0x176   : > { %4822 = vmatprep.subr.bf16.mxu1 %v5965_v53  ;;  %v733_v18 = vadd.f32 %v5869_v4, %v694_v1  ;;  %v695_v19 = vmul.f32 %v5864_v2, %v623_v15  ;;  %4659 = vmatmul.mubr.msk.bf16.gmra.mrb[44].mxu0 %vm777_vm0, %v5972_v7 }
 0x177   : > { %4766 = vmatprep.mubr.msk.bf16.mxu1 %vm777_vm0, %v5974_v8  ;;  %v767_v20 = vmax.f32 %v735_v12, 0.0  ;;  %v736_v21 = vadd.f32 %v5869_v4, %v697_v13  ;;  %4662 = vmatprep.mubr.msk.bf16.mxu0 %vm777_vm0, %v5978_v16 }
 0x178   : > { %4767 = vmatmul.mubr.msk.bf16.gmra.mrb[4].mxu1 %vm777_vm0, %v5980_v17  ;;  %v765_v22 = vmax.f32 %v733_v18, 0.0  ;;  %v734_v23 = vadd.f32 %v5869_v4, %v695_v19  ;;  %v938_v43 = vld [vmem:[#allocation2 + $0xf1] sm:$0xff] }
 0x179   : > { %856 = vst.msk [vmem:[#allocation2 + $0x121] sm:$0xff] %vm777_vm0, %v767_v20  ;;  %v768_v24 = vmax.f32 %v736_v21, 0.0  ;;  %v936_v27 = vld [vmem:[#allocation2 + $0xd9] sm:$0xff]  ;;  %v1737_v45 = vld [vmem:[#allocation2 + $0xf0] sm:$0xff] }
 0x17a   : > { %854 = vst.msk [vmem:[#allocation2 + $0x109] sm:$0xff] %vm777_vm0, %v765_v22  ;;  %v766_v25 = vmax.f32 %v734_v23, 0.0  ;;  %v4636_v26 = vpop.f32.mrb[24].mxu0  ;;  %v939_v28 = vld [vmem:[#allocation2 + $0xf9] sm:$0xff] }
 0x17b   : > { %v1738_v29 = vld [vmem:[#allocation2 + $0xf8] sm:$0xff]  ;;  %857 = vst.msk [vmem:[#allocation2 + $0x129] sm:$0xff] %vm777_vm0, %v768_v24  ;;  %v700_v30 = vmul.f32 %v4636_v26, %v5864_v2  ;;  %v636_v31 = vpop.f32.mrb[25].mxu0  ;;  %v937_v32 = vld [vmem:[#allocation2 + $0xe1] sm:$0xff]  ;;  %v6007_v49 = vpack.c.bf16 %v939_v28, %v938_v43 }
 0x17c   : > { %v1735_v33 = vld [vmem:[#allocation2 + $0xd8] sm:$0xff]  ;;  %v1736_v36 = vld [vmem:[#allocation2 + $0xe0] sm:$0xff]  ;;  %855 = vst.msk [vmem:[#allocation2 + $0x111] sm:$0xff] %vm777_vm0, %v766_v25  ;;  %v698_v37 = vmul.f32 %v5864_v2, %v636_v31  ;;  %v4637_v38 = vpop.f32.mrb[26].mxu0  ;;  %v6001_v39 = vpack.c.bf16 %v937_v32, %v936_v27  ;;  %v6009_v51 = vpack.c.bf16 %v1738_v29, %v1737_v45 }
 0x17d   : > { %v6003_v40 = vpack.c.bf16 %v1736_v36, %v1735_v33  ;;  %v739_v46 = vadd.f32 %v5869_v4, %v700_v30  ;;  %v701_v47 = vmul.f32 %v4637_v38, %v5864_v2  ;;  %v639_v48 = vpop.f32.mrb[27].mxu0 }
 0x17e   : > { %v737_v52 = vadd.f32 %v5869_v4, %v698_v37  ;;  %v699_v54 = vmul.f32 %v5864_v2, %v639_v48  ;;  %4663 = vmatmul.mubr.msk.bf16.gmra.mrb[48].mxu0 %vm777_vm0, %v6001_v39 }
 0x17f   : > { %4770 = vmatprep.mubr.msk.bf16.mxu1 %vm777_vm0, %v6003_v40  ;;  %v771_v55 = vmax.f32 %v739_v46, 0.0  ;;  %v740_v56 = vadd.f32 %v5869_v4, %v701_v47  ;;  %4666 = vmatprep.mubr.msk.bf16.mxu0 %vm777_vm0, %v6007_v49 }
 0x180   : > { %4771 = vmatmul.mubr.msk.bf16.gmra.mrb[8].mxu1 %vm777_vm0, %v6009_v51  ;;  %v769_v58 = vmax.f32 %v737_v52, 0.0  ;;  %v738_v59 = vadd.f32 %v5869_v4, %v699_v54  ;;  %v942_v21 = vld [vmem:[#allocation2 + $0x121] sm:$0xff] }
 0x181   : > { %860 = vst.msk [vmem:[#allocation2 + $0x151] sm:$0xff] %vm777_vm0, %v771_v55  ;;  %v772_v60 = vmax.f32 %v740_v56, 0.0  ;;  %v940_v0 = vld [vmem:[#allocation2 + $0x109] sm:$0xff]  ;;  %v1741_v22 = vld [vmem:[#allocation2 + $0x120] sm:$0xff] }
 0x182   : > { %858 = vst.msk [vmem:[#allocation2 + $0x139] sm:$0xff] %vm777_vm0, %v769_v58  ;;  %v770_v61 = vmax.f32 %v738_v59, 0.0  ;;  %v4640_v3 = vpop.f32.mrb[28].mxu0  ;;  %v943_v5 = vld [vmem:[#allocation2 + $0x129] sm:$0xff]  ;;  %v866_v58 = vld [vmem:[#allocation2] sm:$0xff] }
 0x183   : > { %v1742_v1 = vld [vmem:[#allocation2 + $0x128] sm:$0xff]  ;;  %861 = vst.msk [vmem:[#allocation2 + $0x159] sm:$0xff] %vm777_vm0, %v772_v60  ;;  %v704_v6 = vmul.f32 %v4640_v3, %v5864_v2  ;;  %v652_v10 = vpop.f32.mrb[29].mxu0  ;;  %v941_v11 = vld [vmem:[#allocation2 + $0x111] sm:$0xff]  ;;  %v6035_v26 = vpack.c.bf16 %v943_v5, %v942_v21 }
 0x184   : > { %v1739_v12 = vld [vmem:[#allocation2 + $0x108] sm:$0xff]  ;;  %v1740_v13 = vld [vmem:[#allocation2 + $0x110] sm:$0xff]  ;;  %859 = vst.msk [vmem:[#allocation2 + $0x141] sm:$0xff] %vm777_vm0, %v770_v61  ;;  %v702_v15 = vmul.f32 %v5864_v2, %v652_v10  ;;  %v4641_v18 = vpop.f32.mrb[30].mxu0  ;;  %v6029_v19 = vpack.c.bf16 %v941_v11, %v940_v0  ;;  %v6037_v27 = vpack.c.bf16 %v1742_v1, %v1741_v22 }
 0x185   : > { %v6031_v20 = vpack.c.bf16 %v1740_v13, %v1739_v12  ;;  %v743_v23 = vadd.f32 %v5869_v4, %v704_v6  ;;  %v705_v24 = vmul.f32 %v4641_v18, %v5864_v2  ;;  %v655_v25 = vpop.f32.mrb[31].mxu0  ;;  %v867_v59 = vld [vmem:[#allocation2 + $0x8] sm:$0xff]  ;;  %v869_v13 = vld [vmem:[#allocation2 + $0x20] sm:$0xff]  ;;  %v868_v18 = vld [vmem:[#allocation2 + $0x18] sm:$0xff] }
 0x186   : > { %v741_v28 = vadd.f32 %v5869_v4, %v702_v15  ;;  %v703_v29 = vmul.f32 %v5864_v2, %v655_v25  ;;  %4667 = vmatmul.mubr.msk.bf16.gmra.mrb[52].mxu0 %vm777_vm0, %v6029_v19  ;;  %v898_v1 = vpack.c.bf16 %v867_v59, %v866_v58  ;;  %v871_v15 = vld [vmem:[#allocation2 + $0x38] sm:$0xff]  ;;  %v6086_v21 = vpack.c.bf16 %v869_v13, %v868_v18  ;;  %v870_v22 = vld [vmem:[#allocation2 + $0x30] sm:$0xff]  ;;  %v2340_v59 = vld [vmem:[#allocation2 + $0x82] sm:$0xff] }
 0x187   : > { %4774 = vmatprep.mubr.msk.bf16.mxu1 %vm777_vm0, %v6031_v20  ;;  %v775_v30 = vmax.f32 %v743_v23, 0.0  ;;  %v744_v31 = vadd.f32 %v5869_v4, %v705_v24  ;;  %4670 = vmatprep.mubr.msk.bf16.mxu0 %vm777_vm0, %v6035_v26  ;;  %v6088_v23 = vpack.c.bf16 %v871_v15, %v870_v22  ;;  %v5343_v24 = vld [vmem:[#allocation6 + $0x58] sm:$0xff]   ;;  %v5345_v25 = vld [vmem:[#allocation6 + $0x28] sm:$0xff]  }
 0x188   : > { %4775 = vmatmul.mubr.msk.bf16.gmra.mrb[12].mxu1 %vm777_vm0, %v6037_v27  ;;  %v773_v32 = vmax.f32 %v741_v28, 0.0  ;;  %v742_v33 = vadd.f32 %v5869_v4, %v703_v29  ;;  %v946_v4 = vld [vmem:[#allocation2 + $0x151] sm:$0xff]  ;;  %v875_v29 = vld [vmem:[#allocation2 + $0x68] sm:$0xff]  ;;  %v2339_v58 = vld [vmem:[#allocation2 + $0x7a] sm:$0xff] }
 0x189   : > { %864 = vst.msk [vmem:[#allocation2 + $0x181] sm:$0xff] %vm777_vm0, %v775_v30  ;;  %v776_v2 = vmax.f32 %v744_v31, 0.0  ;;  %v944_v37 = vld [vmem:[#allocation2 + $0x139] sm:$0xff]  ;;  %v1745_v54 = vld [vmem:[#allocation2 + $0x150] sm:$0xff]  ;;  %v872_v30 = vld [vmem:[#allocation2 + $0x48] sm:$0xff] }
 0x18a   : > { %862 = vst.msk [vmem:[#allocation2 + $0x169] sm:$0xff] %vm777_vm0, %v773_v32  ;;  %v774_v36 = vmax.f32 %v742_v33, 0.0  ;;  %v947_v38 = vld [vmem:[#allocation2 + $0x159] sm:$0xff]  ;;  %v5346_v28 = vld [vmem:[#allocation6 + $0x60] sm:$0xff]   ;;  %v2348_v18 = vld [vmem:[#allocation2 + $0xe2] sm:$0xff] }
 0x18b   : > { %v1746_v43 = vld [vmem:[#allocation2 + $0x158] sm:$0xff]  ;;  %865 = vst.msk [vmem:[#allocation2 + $0x189] sm:$0xff] %vm777_vm0, %v776_v2  ;;  %v945_v45 = vld [vmem:[#allocation2 + $0x141] sm:$0xff]  ;;  %v6059_v55 = vpack.c.bf16 %v947_v38, %v946_v4  ;;  %v1430_v13 = vld [vmem:[#allocation2 + $0xca] sm:$0xff] }
 0x18c   : > { %v1743_v46 = vld [vmem:[#allocation2 + $0x138] sm:$0xff]  ;;  %v1744_v47 = vld [vmem:[#allocation2 + $0x140] sm:$0xff]  ;;  %863 = vst.msk [vmem:[#allocation2 + $0x171] sm:$0xff] %vm777_vm0, %v774_v36  ;;  %v6055_v48 = vpack.c.bf16 %v945_v45, %v944_v37  ;;  %v6061_v56 = vpack.c.bf16 %v1746_v43, %v1745_v54  ;;  %v2335_v37 = vld [vmem:[#allocation2 + $0x4a] sm:$0xff] }
 0x18d   : > { %v6057_v52 = vpack.c.bf16 %v1744_v47, %v1743_v46  ;;  %v874_v32 = vld [vmem:[#allocation2 + $0x60] sm:$0xff]  ;;  %v1417_v2 = vld [vmem:[#allocation2 + $0x32] sm:$0xff]  ;;  %v1422_v54 = vld [vmem:[#allocation2 + $0x6a] sm:$0xff] }
 0x18e   : > { %4671 = vmatmul.mubr.msk.bf16.gmra.mrb[56].mxu0 %vm777_vm0, %v6055_v48  ;;  %v6102_v33 = vpack.c.bf16 %v875_v29, %v874_v32  ;;  %v1418_v36 = vld [vmem:[#allocation2 + $0x3a] sm:$0xff]  ;;  %v2336_v38 = vld [vmem:[#allocation2 + $0x52] sm:$0xff]  ;;  %v1421_v4 = vld [vmem:[#allocation2 + $0x62] sm:$0xff] }
 0x18f   : > { %4778 = vmatprep.mubr.msk.bf16.mxu1 %vm777_vm0, %v6057_v52  ;;  %4674 = vmatprep.mubr.msk.bf16.mxu0 %vm777_vm0, %v6059_v55  ;;  %v6161_v43 = vpack.c.bf16 %v1418_v36, %v1417_v2  ;;  %v5347_v45 = vld [vmem:[#allocation6 + $0x68] sm:$0xff]   ;;  %v6164_v46 = vpack.c.bf16 %v2336_v38, %v2335_v37  ;;  %v6173_v47 = vld [vmem:[#allocation6 + $0x70] sm:$0xff]  }
 0x190   : > { %4779 = vmatmul.mubr.msk.bf16.gmra.mrb[16].mxu1 %vm777_vm0, %v6061_v56  ;;  %v1749_v11 = vld [vmem:[#allocation2 + $0x180] sm:$0xff]  ;;  %v2352_v29 = vld [vmem:[#allocation2 + $0x112] sm:$0xff] }
 0x191   : > { %v948_v60 = vld [vmem:[#allocation2 + $0x169] sm:$0xff]  ;;  %v2347_v15 = vld [vmem:[#allocation2 + $0xda] sm:$0xff] }
 0x192   : > { %v1750_v61 = vld [vmem:[#allocation2 + $0x188] sm:$0xff] }
 0x193   : > { %v949_v3 = vld [vmem:[#allocation2 + $0x171] sm:$0xff]  ;;  %v1747_v0 = vld [vmem:[#allocation2 + $0x168] sm:$0xff]  ;;  %v6075_v12 = vpack.c.bf16 %v1750_v61, %v1749_v11  ;;  %v6182_v61 = vpack.c.bf16 %v2340_v59, %v2339_v58 }
 0x194   : > { %v1748_v5 = vld [vmem:[#allocation2 + $0x170] sm:$0xff]  ;;  %v6071_v6 = vpack.c.bf16 %v949_v3, %v948_v60  ;;  %v6176_v60 = vpack.c.bf16 %v1422_v54, %v1421_v4  ;;  %v1426_v3 = vld [vmem:[#allocation2 + $0x9a] sm:$0xff]  ;;  %v1429_v11 = vld [vmem:[#allocation2 + $0xc2] sm:$0xff] }
 0x195   : > { %v6073_v10 = vpack.c.bf16 %v1748_v5, %v1747_v0  ;;  %v2343_v0 = vld [vmem:[#allocation2 + $0xaa] sm:$0xff]  ;;  %v6202_v22 = vpack.c.bf16 %v1430_v13, %v1429_v11  ;;  %v2360_v36 = vld [vmem:[#allocation2 + $0x172] sm:$0xff] }
 0x196   : > { %4675 = vmatmul.mubr.msk.bf16.gmra.mrb[60].mxu0 %vm777_vm0, %v6071_v6  ;;  %v2359_v2 = vld [vmem:[#allocation2 + $0x16a] sm:$0xff] }
 0x197   : > { %4782 = vmatprep.mubr.msk.bf16.mxu1 %vm777_vm0, %v6073_v10  ;;  %4682 = vmatprep.mubr.msk.bf16.mxu0 %vm777_vm0, %v898_v1  ;;  %v6242_v38 = vpack.c.bf16 %v2360_v36, %v2359_v2  ;;  %v2362_v4 = vld [vmem:[#allocation2 + $0x18a] sm:$0xff] }
 0x198   : > { %4783 = vmatmul.mubr.msk.bf16.gmra.mrb[20].mxu1 %vm777_vm0, %v6075_v12  ;;  %v5349_v58 = vld [vmem:[#allocation6 + $0x78] sm:$0xff]  }
 0x199   : > { %4790 = vmatprep.mubr.msk.bf16.mxu1 %vm777_vm0, %v5897_v44  ;;  %v873_v44 = vld [vmem:[#allocation2 + $0x50] sm:$0xff] }
 0x19a   : > { %v6100_v31 = vpack.c.bf16 %v873_v44, %v872_v30  ;;  %v1434_v44 = vld [vmem:[#allocation2 + $0xfa] sm:$0xff]  ;;  %v2954_v11 = vld [vmem:[#allocation2 + $0xa9] sm:$0xff] }
 0x19e   : > { %4683 = vmatmul.mubr.msk.bf16.vlgmr.msra.gmra.mrb[32].mxu0 %vm777_vm0, %v6086_v21 }
 0x19f   : > { %4686 = vmatprep.mubr.msk.bf16.mxu0 %vm777_vm0, %v6088_v23  ;;  %4715 = vmatpush3.bf16.msra.mxu0 %v5912_v57  ;;  %v1414_v57 = vld [vmem:[#allocation2 + $0xa] sm:$0xff] }
 0x1a0   : > { %4791 = vmatmul.mubr.msk.bf16.vlgmr.msra.gmra.mrb[24].mxu1 %vm777_vm0, %v5901_v50  ;;  %4716 = vmatprep.subr.bf16.mxu0 %v5345_v25  ;;  %v1413_v50 = vld [vmem:[#allocation2 + $0x2] sm:$0xff] }
 0x1a1   : > { %4823 = vmatpush3.bf16.msra.mxu1 %v5965_v53  ;;  %4794 = vmatprep.mubr.msk.bf16.mxu1 %vm777_vm0, %v5920_v9  ;;  %v2056_v9 = vld [vmem:[#allocation2 + $0x189] sm:$0xff]  ;;  %v2055_v53 = vld [vmem:[#allocation2 + $0x181] sm:$0xff] }
 0x1a2   : > { %4824 = vmatprep.subr.bf16.mxu1 %v5343_v24 }
 0x1a3   : > { %4717 = vmatpush3.bf16.msra.mxu0 %v5345_v25  ;;  %v1433_v25 = vld [vmem:[#allocation2 + $0xf2] sm:$0xff] }
 0x1a4   : > { %4750 = vmatprep.subr.bf16.mxu0 %v5847_v62  ;;  %v6214_v30 = vpack.c.bf16 %v1434_v44, %v1433_v25  ;;  %v5352_v25 = vld [vmem:[%s6719_s7] sm:$0xff]  }
 0x1a5   : > { %4825 = vmatpush3.bf16.msra.mxu1 %v5343_v24  ;;  %v6206_v24 = vpack.c.bf16 %v2348_v18, %v2347_v15  ;;  %v2956_v15 = vld [vmem:[#allocation2 + $0xc1] sm:$0xff] }
 0x1a6   : > { %4858 = vmatprep.subr.bf16.mxu1 %v5346_v28  ;;  %4687 = vmatmul.mubr.msk.bf16.gmra.mrb[36].mxu0 %vm777_vm0, %v6100_v31 }
 0x1a7   : > { %4690 = vmatprep.mubr.msk.bf16.mxu0 %vm777_vm0, %v6102_v33 }
 0x1a8   : > { %4795 = vmatmul.mubr.msk.bf16.gmra.mrb[28].mxu1 %vm777_vm0, %v5925_v14  ;;  %v2331_v14 = vld [vmem:[#allocation2 + $0x1a] sm:$0xff] }
 0x1a9   : > { %4798 = vmatprep.mubr.msk.bf16.mxu1 %vm777_vm0, %v5941_v34  ;;  %v2332_v34 = vld [vmem:[#allocation2 + $0x22] sm:$0xff] }
 0x1ae   : > { %4691 = vmatmul.mubr.msk.bf16.gmra.mrb[40].mxu0 %vm777_vm0, %v5943_v35 }
 0x1af   : > { %4694 = vmatprep.mubr.msk.bf16.mxu0 %vm777_vm0, %v5949_v42 }
 0x1b0   : > { %4799 = vmatmul.mubr.msk.bf16.gmra.mrb[0].mxu1 %vm777_vm0, %v5947_v41  ;;  %v1445_v41 = vpack.c.bf16 %v1414_v57, %v1413_v50  ;;  %v1437_v50 = vld [vmem:[#allocation2 + $0x122] sm:$0xff]  ;;  %v1438_v57 = vld [vmem:[#allocation2 + $0x12a] sm:$0xff] }
 0x1b1   : > { %4802 = vmatprep.mubr.msk.bf16.mxu1 %vm777_vm0, %v5972_v7  ;;  %v6153_v7 = vpack.c.bf16 %v2056_v9, %v2055_v53  ;;  %v2355_v9 = vld [vmem:[#allocation2 + $0x13a] sm:$0xff]  ;;  %v1441_v53 = vld [vmem:[#allocation2 + $0x152] sm:$0xff] }
 0x1b6   : > { %4695 = vmatmul.mubr.msk.bf16.gmra.mrb[44].mxu0 %vm777_vm0, %v5974_v8 }
 0x1b7   : > { %4698 = vmatprep.mubr.msk.bf16.mxu0 %vm777_vm0, %v5980_v17 }
 0x1b8   : > { %4803 = vmatmul.mubr.msk.bf16.gmra.mrb[4].mxu1 %vm777_vm0, %v5978_v16  ;;  %v2363_v16 = vpack.c.bf16 %v2332_v34, %v2331_v14  ;;  %v2356_v14 = vld [vmem:[#allocation2 + $0x142] sm:$0xff]  ;;  %v6226_v34 = vpack.c.bf16 %v1438_v57, %v1437_v50 }
 0x1b9   : > { %4806 = vmatprep.mubr.msk.bf16.mxu1 %vm777_vm0, %v6001_v39 }
 0x1be   : > { %4699 = vmatmul.mubr.msk.bf16.gmra.mrb[48].mxu0 %vm777_vm0, %v6003_v40 }
 0x1bf   : > { %4702 = vmatprep.mubr.msk.bf16.mxu0 %vm777_vm0, %v6009_v51 }
 0x1c0   : > { %4807 = vmatmul.mubr.msk.bf16.gmra.mrb[8].mxu1 %vm777_vm0, %v6007_v49 }
 0x1c1   : > { %4810 = vmatprep.mubr.msk.bf16.mxu1 %vm777_vm0, %v6029_v19 }
 0x1c6   : > { %4703 = vmatmul.mubr.msk.bf16.gmra.mrb[52].mxu0 %vm777_vm0, %v6031_v20 }
 0x1c7   : > { %4706 = vmatprep.mubr.msk.bf16.mxu0 %vm777_vm0, %v6037_v27 }
 0x1c8   : > { %4811 = vmatmul.mubr.msk.bf16.gmra.mrb[12].mxu1 %vm777_vm0, %v6035_v26 }
 0x1c9   : > { %4814 = vmatprep.mubr.msk.bf16.mxu1 %vm777_vm0, %v6055_v48 }
 0x1ce   : > { %4707 = vmatmul.mubr.msk.bf16.gmra.mrb[56].mxu0 %vm777_vm0, %v6057_v52 }
 0x1cf   : > { %4710 = vmatprep.mubr.msk.bf16.mxu0 %vm777_vm0, %v6061_v56 }
 0x1d0   : > { %4815 = vmatmul.mubr.msk.bf16.gmra.mrb[16].mxu1 %vm777_vm0, %v6059_v55 }
 0x1d1   : > { %4818 = vmatprep.mubr.msk.bf16.mxu1 %vm777_vm0, %v6071_v6 }
 0x1d6   : > { %4711 = vmatmul.mubr.msk.bf16.gmra.mrb[60].mxu0 %vm777_vm0, %v6073_v10 }
 0x1d7   : > { %4718 = vmatprep.mubr.msk.bf16.mxu0 %vm777_vm0, %v1445_v41  ;;  %v6230_v41 = vpack.c.bf16 %v2356_v14, %v2355_v9 }
 0x1d8   : > { %4819 = vmatmul.mubr.msk.bf16.gmra.mrb[20].mxu1 %vm777_vm0, %v6153_v7 }
 0x1d9   : > { %4826 = vmatprep.mubr.msk.bf16.mxu1 %vm777_vm0, %v2363_v16 }
 0x1de   : > { %4719 = vmatmul.mubr.msk.bf16.vlgmr.msra.gmra.mrb[32].mxu0 %vm777_vm0, %v2363_v16  ;;  %v1442_v16 = vld [vmem:[#allocation2 + $0x15a] sm:$0xff] }
 0x1df   : > { %4722 = vmatprep.mubr.msk.bf16.mxu0 %vm777_vm0, %v6161_v43  ;;  %4751 = vmatpush3.bf16.msra.mxu0 %v5847_v62  ;;  %v1425_v62 = vld [vmem:[#allocation2 + $0x92] sm:$0xff]  ;;  %v6238_v37 = vpack.c.bf16 %v1442_v16, %v1441_v53 }
 0x1e0   : > { %4827 = vmatmul.mubr.msk.bf16.vlgmr.msra.gmra.mrb[24].mxu1 %vm777_vm0, %v6161_v43  ;;  %4752 = vmatprep.subr.bf16.mxu0 %v5851_v63  ;;  %v6190_v5 = vpack.c.bf16 %v1426_v3, %v1425_v62  ;;  %v2952_v62 = vld [vmem:[#allocation2 + $0x91] sm:$0xff] }
 0x1e1   : > { %4859 = vmatpush3.bf16.msra.mxu1 %v5346_v28  ;;  %4830 = vmatprep.mubr.msk.bf16.mxu1 %vm777_vm0, %v6164_v46  ;;  %v2351_v28 = vld [vmem:[#allocation2 + $0x10a] sm:$0xff] }
 0x1e2   : > { %4860 = vmatprep.subr.bf16.mxu1 %v5347_v45  ;;  %v6218_v32 = vpack.c.bf16 %v2352_v29, %v2351_v28 }
 0x1e3   : > { %4753 = vmatpush3.bf16.msra.mxu0 %v5851_v63  ;;  %v2344_v63 = vld [vmem:[#allocation2 + $0xb2] sm:$0xff] }
 0x1e4   : > { %v6194_v1 = vpack.c.bf16 %v2344_v63, %v2343_v0  ;;  %v2955_v0 = vld [vmem:[#allocation2 + $0xb1] sm:$0xff]  ;;  %v2957_v63 = vld [vmem:[#allocation2 + $0xc9] sm:$0xff]  ;;  %4966 = vmatprep.subr.bf16.mxu0 %v5352_v25 }
 0x1e5   : > { %4861 = vmatpush3.bf16.msra.mxu1 %v5347_v45  ;;  %v2361_v45 = vld [vmem:[#allocation2 + $0x182] sm:$0xff]  ;;  %v2981_v13 = vpack.c.bf16 %v2955_v0, %v2954_v11  ;;  %v2982_v18 = vpack.c.bf16 %v2957_v63, %v2956_v15 }
 0x1e6   : > { %4894 = vmatprep.subr.bf16.mxu1 %v6173_v47  ;;  %4723 = vmatmul.mubr.msk.bf16.gmra.mrb[36].mxu0 %vm777_vm0, %v6164_v46  ;;  %v6250_v54 = vpack.c.bf16 %v2362_v4, %v2361_v45 }
 0x1e7   : > { %4726 = vmatprep.mubr.msk.bf16.mxu0 %vm777_vm0, %v6176_v60 }
 0x1e8   : > { %4831 = vmatmul.mubr.msk.bf16.gmra.mrb[28].mxu1 %vm777_vm0, %v6176_v60 }
 0x1e9   : > { %4834 = vmatprep.mubr.msk.bf16.mxu1 %vm777_vm0, %v6182_v61 }
 0x1ee   : > { %4727 = vmatmul.mubr.msk.bf16.gmra.mrb[40].mxu0 %vm777_vm0, %v6182_v61 }
 0x1ef   : > { %4730 = vmatprep.mubr.msk.bf16.mxu0 %vm777_vm0, %v6190_v5 }
 0x1f0   : > { %4835 = vmatmul.mubr.msk.bf16.gmra.mrb[0].mxu1 %vm777_vm0, %v6190_v5 }
 0x1f1   : > { %4838 = vmatprep.mubr.msk.bf16.mxu1 %vm777_vm0, %v6194_v1 }
 0x1f6   : > { %4731 = vmatmul.mubr.msk.bf16.gmra.mrb[44].mxu0 %vm777_vm0, %v6194_v1 }
 0x1f7   : > { %4734 = vmatprep.mubr.msk.bf16.mxu0 %vm777_vm0, %v6202_v22 }
 0x1f8   : > { %4839 = vmatmul.mubr.msk.bf16.gmra.mrb[4].mxu1 %vm777_vm0, %v6202_v22 }
 0x1f9   : > { %4842 = vmatprep.mubr.msk.bf16.mxu1 %vm777_vm0, %v6206_v24 }
 0x1fe   : > { %4735 = vmatmul.mubr.msk.bf16.gmra.mrb[48].mxu0 %vm777_vm0, %v6206_v24 }
 0x1ff   : > { %4738 = vmatprep.mubr.msk.bf16.mxu0 %vm777_vm0, %v6214_v30 }
 0x200   : > { %4843 = vmatmul.mubr.msk.bf16.gmra.mrb[8].mxu1 %vm777_vm0, %v6214_v30 }
 0x201   : > { %4846 = vmatprep.mubr.msk.bf16.mxu1 %vm777_vm0, %v6218_v32 }
 0x206   : > { %4739 = vmatmul.mubr.msk.bf16.gmra.mrb[52].mxu0 %vm777_vm0, %v6218_v32 }
 0x207   : > { %4742 = vmatprep.mubr.msk.bf16.mxu0 %vm777_vm0, %v6226_v34 }
 0x208   : > { %4847 = vmatmul.mubr.msk.bf16.gmra.mrb[12].mxu1 %vm777_vm0, %v6226_v34 }
 0x209   : > { %4850 = vmatprep.mubr.msk.bf16.mxu1 %vm777_vm0, %v6230_v41 }
 0x20e   : > { %4743 = vmatmul.mubr.msk.bf16.gmra.mrb[56].mxu0 %vm777_vm0, %v6230_v41 }
 0x20f   : > { %4746 = vmatprep.mubr.msk.bf16.mxu0 %vm777_vm0, %v6238_v37 }
 0x210   : > { %4851 = vmatmul.mubr.msk.bf16.gmra.mrb[16].mxu1 %vm777_vm0, %v6238_v37 }
 0x211   : > { %4854 = vmatprep.mubr.msk.bf16.mxu1 %vm777_vm0, %v6242_v38 }
 0x216   : > { %4747 = vmatmul.mubr.msk.bf16.gmra.mrb[60].mxu0 %vm777_vm0, %v6242_v38 }
 0x217   : > { %4754 = vmatprep.mubr.msk.bf16.mxu0 %vm777_vm0, %v6086_v21  ;;  %v5350_v21 = vld [vmem:[#allocation6 + $0x80] sm:$0xff]  }
 0x218   : > { %4855 = vmatmul.mubr.msk.bf16.gmra.mrb[20].mxu1 %vm777_vm0, %v6250_v54 }
 0x219   : > { %4862 = vmatprep.mubr.msk.bf16.mxu1 %vm777_vm0, %v6088_v23 }
 0x21e   : > { %4755 = vmatmul.mubr.msk.bf16.vlgmr.msra.gmra.mrb[32].mxu0 %vm777_vm0, %v6088_v23  ;;  %v2948_v23 = vld [vmem:[#allocation2 + $0x61] sm:$0xff] }
 0x21f   : > { %4758 = vmatprep.mubr.msk.bf16.mxu0 %vm777_vm0, %v6100_v31  ;;  %4967 = vmatpush3.bf16.msra.mxu0 %v5352_v25 }
 0x220   : > { %4863 = vmatmul.mubr.msk.bf16.vlgmr.msra.gmra.mrb[24].mxu1 %vm777_vm0, %v6100_v31  ;;  %v5351_v31 = vld [vmem:[#allocation6 + $0x88] sm:$0xff]  }
 0x221   : > { %4895 = vmatpush3.bf16.msra.mxu1 %v6173_v47  ;;  %4866 = vmatprep.mubr.msk.bf16.mxu1 %vm777_vm0, %v6102_v33  ;;  %v2950_v47 = vld [vmem:[#allocation2 + $0x79] sm:$0xff] }
 0x222   : > { %4896 = vmatprep.subr.bf16.mxu1 %v5349_v58 }
 0x225   : > { %4897 = vmatpush3.bf16.msra.mxu1 %v5349_v58 }
 0x226   : > { %4930 = vmatprep.subr.bf16.mxu1 %v5350_v21  ;;  %4759 = vmatmul.mubr.msk.bf16.gmra.mrb[36].mxu0 %vm777_vm0, %v6102_v33  ;;  %v2953_v33 = vld [vmem:[#allocation2 + $0x99] sm:$0xff] }
 0x227   : > { %v2980_v3 = vpack.c.bf16 %v2953_v33, %v2952_v62 }
 0x228   : > { %4867 = vmatmul.mubr.msk.bf16.gmra.mrb[28].mxu1 %vm777_vm0, %v5943_v35  ;;  %v2668_v35 = vld [vmem:[#allocation2 + $0x198] sm:$0xff] }
 0x229   : > { %4870 = vmatprep.mubr.msk.bf16.mxu1 %vm777_vm0, %v5949_v42  ;;  %v2669_v42 = vld [vmem:[#allocation2 + $0x1a0] sm:$0xff] }
 0x230   : > { %4871 = vmatmul.mubr.msk.bf16.gmra.mrb[0].mxu1 %vm777_vm0, %v5974_v8  ;;  %v2685_v8 = vpack.c.bf16 %v2669_v42, %v2668_v35  ;;  %v5353_v35 = vld [vmem:[%s6719_s7 + $0x8] sm:$0xff]  }
 0x231   : > { %4874 = vmatprep.mubr.msk.bf16.mxu1 %vm777_vm0, %v5980_v17  ;;  %v2945_v17 = vld [vmem:[#allocation2 + $0x39] sm:$0xff]  ;;  %4968 = vmatprep.subr.bf16.mxu0 %v5353_v35 }
 0x232   : > { %4969 = vmatpush3.bf16.msra.mxu0 %v5353_v35 }
 0x238   : > { %4875 = vmatmul.mubr.msk.bf16.gmra.mrb[4].mxu1 %vm777_vm0, %v6003_v40  ;;  %v2944_v40 = vld [vmem:[#allocation2 + $0x31] sm:$0xff] }
 0x239   : > { %4878 = vmatprep.mubr.msk.bf16.mxu1 %vm777_vm0, %v6009_v51  ;;  %v2976_v51 = vpack.c.bf16 %v2945_v17, %v2944_v40 }
 0x240   : > { %4879 = vmatmul.mubr.msk.bf16.gmra.mrb[8].mxu1 %vm777_vm0, %v6031_v20  ;;  %v2947_v20 = vld [vmem:[#allocation2 + $0x51] sm:$0xff] }
 0x241   : > { %4882 = vmatprep.mubr.msk.bf16.mxu1 %vm777_vm0, %v6037_v27  ;;  %v2949_v27 = vld [vmem:[#allocation2 + $0x69] sm:$0xff] }
 0x248   : > { %4883 = vmatmul.mubr.msk.bf16.gmra.mrb[12].mxu1 %vm777_vm0, %v6057_v52  ;;  %v2946_v52 = vld [vmem:[#allocation2 + $0x49] sm:$0xff] }
 0x249   : > { %4886 = vmatprep.mubr.msk.bf16.mxu1 %vm777_vm0, %v6061_v56  ;;  %v2977_v56 = vpack.c.bf16 %v2947_v20, %v2946_v52 }
 0x250   : > { %4887 = vmatmul.mubr.msk.bf16.gmra.mrb[16].mxu1 %vm777_vm0, %v6073_v10  ;;  %v2978_v10 = vpack.c.bf16 %v2949_v27, %v2948_v23 }
 0x251   : > { %4890 = vmatprep.mubr.msk.bf16.mxu1 %vm777_vm0, %v6075_v12  ;;  %v2951_v12 = vld [vmem:[#allocation2 + $0x81] sm:$0xff] }
 0x252   : > { %v2979_v59 = vpack.c.bf16 %v2951_v12, %v2950_v47 }
 0x258   : > { %4891 = vmatmul.mubr.msk.bf16.gmra.mrb[20].mxu1 %vm777_vm0, %v2685_v8  ;;  %v6408_v8 = vld [vmem:[%s6717_s5] ss:$0 sm:$0xff] }
 0x259   : > { %4898 = vmatprep.mubr.msk.bf16.mxu1 %vm777_vm0, %v2976_v51  ;;  %v6413_v51 = vld [vmem:[%s6718_s6] ss:$0 sm:$0xff] }
 0x260   : > { %4899 = vmatmul.mubr.msk.bf16.vlgmr.msra.gmra.mrb[24].mxu1 %vm777_vm0, %v2977_v56 }
 0x261   : > { %4931 = vmatpush3.bf16.msra.mxu1 %v5350_v21  ;;  %4902 = vmatprep.mubr.msk.bf16.mxu1 %vm777_vm0, %v2978_v10 }
 0x262   : > { %4932 = vmatprep.subr.bf16.mxu1 %v5351_v31 }
 0x265   : > { %4933 = vmatpush3.bf16.msra.mxu1 %v5351_v31 }
 0x268   : > { %4903 = vmatmul.mubr.msk.bf16.gmra.mrb[28].mxu1 %vm777_vm0, %v2979_v59 }
 0x269   : > { %4906 = vmatprep.mubr.msk.bf16.mxu1 %vm777_vm0, %v2980_v3 }
 0x270   : > { %4907 = vmatmul.mubr.msk.bf16.gmra.mrb[0].mxu1 %vm777_vm0, %v2981_v13 }
 0x271   : > { %4910 = vmatprep.mubr.msk.bf16.mxu1 %vm777_vm0, %v2982_v18 }
 0x278   : > { %4911 = vmatmul.mubr.msk.bf16.gmra.mrb[4].mxu1 %vm777_vm0, %v6001_v39  ;;  %v2974_v39 = vld [vmem:[#allocation2 + $0x199] sm:$0xff] }
 0x279   : > { %4914 = vmatprep.mubr.msk.bf16.mxu1 %vm777_vm0, %v6007_v49  ;;  %v2975_v49 = vld [vmem:[#allocation2 + $0x1a1] sm:$0xff] }
 0x27a   : > { %v2991_v44 = vpack.c.bf16 %v2975_v49, %v2974_v39 }
 0x280   : > { %4915 = vmatmul.mubr.msk.bf16.gmra.mrb[8].mxu1 %vm777_vm0, %v6029_v19 }
 0x281   : > { %4918 = vmatprep.mubr.msk.bf16.mxu1 %vm777_vm0, %v6035_v26 }
 0x288   : > { %4919 = vmatmul.mubr.msk.bf16.gmra.mrb[12].mxu1 %vm777_vm0, %v6055_v48 }
 0x289   : > { %4922 = vmatprep.mubr.msk.bf16.mxu1 %vm777_vm0, %v6059_v55 }
 0x290   : > { %4923 = vmatmul.mubr.msk.bf16.gmra.mrb[16].mxu1 %vm777_vm0, %v6071_v6 }
 0x291   : > { %4926 = vmatprep.mubr.msk.bf16.mxu1 %vm777_vm0, %v6153_v7 }
 0x298   : > { %4927 = vmatmul.mubr.msk.bf16.gmra.mrb[20].mxu1 %vm777_vm0, %v2991_v44 }
 0x299   : > { %4934 = vmatprep.mubr.msk.bf16.mxu1 %vm777_vm0, %v6161_v43 }
 0x2a0   : > { %4935 = vmatmul.mubr.msk.bf16.vlgmr.msra.gmra.mrb[24].mxu1 %vm777_vm0, %v6164_v46 }
 0x2a1   : > { %4938 = vmatprep.mubr.msk.bf16.mxu1 %vm777_vm0, %v6176_v60  ;;  %v3280_v60 = vld [vmem:[#allocation2 + $0x19a] sm:$0xff] }
 0x2a8   : > { %4939 = vmatmul.mubr.msk.bf16.gmra.mrb[28].mxu1 %vm777_vm0, %v6182_v61  ;;  %v3281_v61 = vld [vmem:[#allocation2 + $0x1a2] sm:$0xff] }
 0x2a9   : > { %4942 = vmatprep.mubr.msk.bf16.mxu1 %vm777_vm0, %v6190_v5 }
 0x2b0   : > { %4943 = vmatmul.mubr.msk.bf16.gmra.mrb[0].mxu1 %vm777_vm0, %v6194_v1 }
 0x2b1   : > { %4946 = vmatprep.mubr.msk.bf16.mxu1 %vm777_vm0, %v6202_v22 }
 0x2b8   : > { %4947 = vmatmul.mubr.msk.bf16.gmra.mrb[4].mxu1 %vm777_vm0, %v6206_v24  ;;  %v3297_v24 = vpack.c.bf16 %v3281_v61, %v3280_v60 }
 0x2b9   : > { %4950 = vmatprep.mubr.msk.bf16.mxu1 %vm777_vm0, %v6214_v30 }
 0x2c0   : > { %4951 = vmatmul.mubr.msk.bf16.gmra.mrb[8].mxu1 %vm777_vm0, %v6218_v32 }
 0x2c1   : > { %4954 = vmatprep.mubr.msk.bf16.mxu1 %vm777_vm0, %v6226_v34  ;;  %v6345_v19 = vpop.f32.mrb[40].mxu0 }
 0x2c2   : > { %v6347_v26 = vpop.f32.mrb[41].mxu0 }
 0x2c3   : > { %v6349_v48 = vpop.f32.mrb[42].mxu0 }
 0x2c4   : > { %v6351_v55 = vpop.f32.mrb[43].mxu0 }
 0x2c8   : > { %4955 = vmatmul.mubr.msk.bf16.gmra.mrb[12].mxu1 %vm777_vm0, %v6230_v41 }
 0x2c9   : > { %4958 = vmatprep.mubr.msk.bf16.mxu1 %vm777_vm0, %v6238_v37  ;;  %v6357_v6 = vpop.f32.mrb[44].mxu0 }
 0x2ca   : > { %v6359_v7 = vpop.f32.mrb[45].mxu0 }
 0x2cb   : > { %v6361_v43 = vpop.f32.mrb[46].mxu0 }
 0x2cc   : > { %v6363_v46 = vpop.f32.mrb[47].mxu0 }
 0x2d0   : > { %4959 = vmatmul.mubr.msk.bf16.gmra.mrb[16].mxu1 %vm777_vm0, %v6242_v38 }
 0x2d1   : > { %4962 = vmatprep.mubr.msk.bf16.mxu1 %vm777_vm0, %v6250_v54  ;;  %v6369_v5 = vpop.f32.mrb[48].mxu0 }
 0x2d2   : > { %v6371_v1 = vpop.f32.mrb[49].mxu0 }
 0x2d3   : > { %v6373_v22 = vpop.f32.mrb[50].mxu0 }
 0x2d4   : > { %v6375_v28 = vpop.f32.mrb[51].mxu0 }
 0x2d8   : > { %4963 = vmatmul.mubr.msk.bf16.gmra.mrb[20].mxu1 %vm777_vm0, %v3297_v24 }
 0x2d9   : > { %v6378_v29 = vpop.f32.mrb[52].mxu0 }
 0x2da   : > { %v6380_v30 = vpop.f32.mrb[53].mxu0 }
 0x2db   : > { %v6382_v32 = vpop.f32.mrb[54].mxu0 }
 0x2dc   : > { %v6384_v50 = vpop.f32.mrb[55].mxu0 }
 0x2e1   : > { %v6386_v57 = vpop.f32.mrb[56].mxu0 }
 0x2e2   : > { %v6388_v9 = vpop.f32.mrb[57].mxu0 }
 0x2e3   : > { %v6390_v14 = vpop.f32.mrb[58].mxu0 }
 0x2e4   : > { %v6392_v34 = vpop.f32.mrb[59].mxu0 }
 0x2e9   : > { %v6394_v41 = vpop.f32.mrb[60].mxu0 }
 0x2ea   : > { %v6396_v53 = vpop.f32.mrb[61].mxu0 }
 0x2eb   : > { %v6398_v16 = vpop.f32.mrb[62].mxu0 }
 0x2ec   : > { %v6400_v2 = vpop.f32.mrb[63].mxu0 }
 0x2f1   : > { %v4756_v36 = vpop.f32.mrb[32].mxu0 }
 0x2f2   : > { %v1866_v37 = vpop.f32.mrb[33].mxu0 }
 0x2f3   : > { %v4757_v38 = vpop.f32.mrb[34].mxu0 }
 0x2f4   : > { %v1869_v45 = vpop.f32.mrb[35].mxu0 }
 0x2f9   : > { %v4760_v4 = vpop.f32.mrb[36].mxu0 }
 0x2fa   : > { %v1882_v54 = vpop.f32.mrb[37].mxu0 }
 0x2fb   : > { %v4761_v58 = vpop.f32.mrb[38].mxu0 }
 0x2fc   : > { %v1885_v21 = vpop.f32.mrb[39].mxu0 }
 0x373   : > { %v4936_v42 = vpop.f32.mrb[24].mxu1 }
 0x374   : > { %v5006_v17 = vadd.f32 %v4936_v42, %v4756_v36  ;;  %v3397_v40 = vpop.f32.mrb[25].mxu1 }
 0x375   : > { %v5007_v20 = vadd.f32 %v3397_v40, %v1866_v37  ;;  %v4937_v27 = vpop.f32.mrb[26].mxu1 }
 0x376   : > { %v3565_v52 = vmul.f32 %v5006_v17, %v6408_v8  ;;  %v5008_v56 = vadd.f32 %v4937_v27, %v4757_v38  ;;  %v3400_v23 = vpop.f32.mrb[27].mxu1 }
 0x377   : > { %v3563_v31 = vmul.f32 %v5007_v20, %v6408_v8  ;;  %v5009_v10 = vadd.f32 %v3400_v23, %v1869_v45 }
 0x378   : > { %v3604_v12 = vadd.f32 %v6413_v51, %v3565_v52  ;;  %v3566_v33 = vmul.f32 %v5008_v56, %v6408_v8 }
 0x379   : > { %v3602_v47 = vadd.f32 %v6413_v51, %v3563_v31  ;;  %v3564_v59 = vmul.f32 %v5009_v10, %v6408_v8 }
 0x37a   : > { %v3605_v62 = vadd.f32 %v6413_v51, %v3566_v33  ;;  %v3636_v63 = vmax.f32 %v3604_v12, 0.0 }
 0x37b   : > { %v3603_v3 = vadd.f32 %v6413_v51, %v3564_v59  ;;  %v4940_v0 = vpop.f32.mrb[28].mxu1  ;;  %v3634_v18 = vmax.f32 %v3602_v47, 0.0 }
 0x37c   : > { %v3637_v11 = vmax.f32 %v3605_v62, 0.0  ;;  %v5010_v13 = vadd.f32 %v4940_v0, %v4760_v4  ;;  %v3413_v15 = vpop.f32.mrb[29].mxu1 }
 0x37d   : > { %v3635_v25 = vmax.f32 %v3603_v3, 0.0  ;;  %v5011_v39 = vadd.f32 %v3413_v15, %v1882_v54  ;;  %v4941_v49 = vpop.f32.mrb[30].mxu1 }
 0x37e   : > { %v3667_v44 = vpack.c.bf16 %v3637_v11, %v3636_v63  ;;  %v3569_v60 = vmul.f32 %v5010_v13, %v6408_v8  ;;  %v5012_v61 = vadd.f32 %v4941_v49, %v4761_v58  ;;  %v3416_v24 = vpop.f32.mrb[31].mxu1 }
 0x37f   : > { %v3666_v36 = vpack.c.bf16 %v3635_v25, %v3634_v18  ;;  %v3567_v37 = vmul.f32 %v5011_v39, %v6408_v8  ;;  %v5013_v38 = vadd.f32 %v3416_v24, %v1885_v21 }
 0x380   : > { %v3608_v45 = vadd.f32 %v6413_v51, %v3569_v60  ;;  %v3570_v35 = vmul.f32 %v5012_v61, %v6408_v8 }
 0x381   : > { %v3606_v4 = vadd.f32 %v6413_v51, %v3567_v37  ;;  %v3568_v42 = vmul.f32 %v5013_v38, %v6408_v8  ;;  %4970 = vmatprep.mubr.msk.bf16.mxu0 %vm777_vm0, %v3666_v36 }
 0x382   : > { %v3609_v54 = vadd.f32 %v6413_v51, %v3570_v35  ;;  %4971 = vmatmul.mubr.msk.bf16.vlgmr.msra.gmra.mrb[64].mxu0 %vm777_vm0, %v3667_v44  ;;  %v3640_v40 = vmax.f32 %v3608_v45, 0.0 }
 0x383   : > { %v3607_v58 = vadd.f32 %v6413_v51, %v3568_v42  ;;  %v4944_v17 = vpop.f32.mrb[0].mxu1  ;;  %v3638_v52 = vmax.f32 %v3606_v4, 0.0 }
 0x384   : > { %v3641_v20 = vmax.f32 %v3609_v54, 0.0  ;;  %v5014_v21 = vadd.f32 %v4944_v17, %v6345_v19  ;;  %v3429_v27 = vpop.f32.mrb[1].mxu1 }
 0x385   : > { %v3639_v56 = vmax.f32 %v3607_v58, 0.0  ;;  %v5015_v23 = vadd.f32 %v3429_v27, %v6347_v26  ;;  %v4945_v31 = vpop.f32.mrb[2].mxu1 }
 0x386   : > { %v3669_v10 = vpack.c.bf16 %v3641_v20, %v3640_v40  ;;  %v3573_v12 = vmul.f32 %v5014_v21, %v6408_v8  ;;  %v5016_v33 = vadd.f32 %v4945_v31, %v6349_v48  ;;  %v3432_v47 = vpop.f32.mrb[3].mxu1 }
 0x387   : > { %v3668_v59 = vpack.c.bf16 %v3639_v56, %v3638_v52  ;;  %v3571_v62 = vmul.f32 %v5015_v23, %v6408_v8  ;;  %v5017_v3 = vadd.f32 %v3432_v47, %v6351_v55 }
 0x388   : > { %v3612_v0 = vadd.f32 %v6413_v51, %v3573_v12  ;;  %v3574_v19 = vmul.f32 %v5016_v33, %v6408_v8 }
 0x389   : > { %v3610_v63 = vadd.f32 %v6413_v51, %v3571_v62  ;;  %v3572_v26 = vmul.f32 %v5017_v3, %v6408_v8  ;;  %4974 = vmatprep.mubr.msk.bf16.mxu0 %vm777_vm0, %v3668_v59 }
 0x38a   : > { %v3613_v11 = vadd.f32 %v6413_v51, %v3574_v19  ;;  %4975 = vmatmul.mubr.msk.bf16.gmra.mrb[68].mxu0 %vm777_vm0, %v3669_v10  ;;  %v3644_v15 = vmax.f32 %v3612_v0, 0.0 }
 0x38b   : > { %v3611_v48 = vadd.f32 %v6413_v51, %v3572_v26  ;;  %v4948_v13 = vpop.f32.mrb[4].mxu1  ;;  %v3642_v39 = vmax.f32 %v3610_v63, 0.0 }
 0x38c   : > { %v3645_v18 = vmax.f32 %v3613_v11, 0.0  ;;  %v5018_v55 = vadd.f32 %v4948_v13, %v6357_v6  ;;  %v3445_v25 = vpop.f32.mrb[5].mxu1 }
 0x38d   : > { %v3643_v49 = vmax.f32 %v3611_v48, 0.0  ;;  %v5019_v44 = vadd.f32 %v3445_v25, %v6359_v7  ;;  %v4949_v60 = vpop.f32.mrb[6].mxu1 }
 0x38e   : > { %v3671_v61 = vpack.c.bf16 %v3645_v18, %v3644_v15  ;;  %v3577_v24 = vmul.f32 %v5018_v55, %v6408_v8  ;;  %v5020_v36 = vadd.f32 %v4949_v60, %v6361_v43  ;;  %v3448_v37 = vpop.f32.mrb[7].mxu1 }
 0x38f   : > { %v3670_v38 = vpack.c.bf16 %v3643_v49, %v3642_v39  ;;  %v3575_v45 = vmul.f32 %v5019_v44, %v6408_v8  ;;  %v5021_v35 = vadd.f32 %v3448_v37, %v6363_v46 }
 0x390   : > { %v3616_v4 = vadd.f32 %v6413_v51, %v3577_v24  ;;  %v3578_v6 = vmul.f32 %v5020_v36, %v6408_v8 }
 0x391   : > { %v3614_v42 = vadd.f32 %v6413_v51, %v3575_v45  ;;  %v3576_v7 = vmul.f32 %v5021_v35, %v6408_v8  ;;  %4978 = vmatprep.mubr.msk.bf16.mxu0 %vm777_vm0, %v3670_v38 }
 0x392   : > { %v3617_v54 = vadd.f32 %v6413_v51, %v3578_v6  ;;  %4979 = vmatmul.mubr.msk.bf16.gmra.mrb[72].mxu0 %vm777_vm0, %v3671_v61  ;;  %v3648_v17 = vmax.f32 %v3616_v4, 0.0 }
 0x393   : > { %v3615_v43 = vadd.f32 %v6413_v51, %v3576_v7  ;;  %v4952_v58 = vpop.f32.mrb[8].mxu1  ;;  %v3646_v21 = vmax.f32 %v3614_v42, 0.0 }
 0x394   : > { %v3649_v40 = vmax.f32 %v3617_v54, 0.0  ;;  %v5022_v46 = vadd.f32 %v4952_v58, %v6369_v5  ;;  %v3461_v20 = vpop.f32.mrb[9].mxu1 }
 0x395   : > { %v3647_v27 = vmax.f32 %v3615_v43, 0.0  ;;  %v5023_v52 = vadd.f32 %v3461_v20, %v6371_v1  ;;  %v4953_v56 = vpop.f32.mrb[10].mxu1 }
 0x396   : > { %v3673_v23 = vpack.c.bf16 %v3649_v40, %v3648_v17  ;;  %v3581_v31 = vmul.f32 %v5022_v46, %v6408_v8  ;;  %v5024_v10 = vadd.f32 %v4953_v56, %v6373_v22  ;;  %v3464_v12 = vpop.f32.mrb[11].mxu1 }
 0x397   : > { %v3672_v33 = vpack.c.bf16 %v3647_v27, %v3646_v21  ;;  %v3579_v47 = vmul.f32 %v5023_v52, %v6408_v8  ;;  %v5025_v59 = vadd.f32 %v3464_v12, %v6375_v28 }
 0x398   : > { %v3620_v62 = vadd.f32 %v6413_v51, %v3581_v31  ;;  %v3582_v5 = vmul.f32 %v5024_v10, %v6408_v8 }
 0x399   : > { %v3618_v3 = vadd.f32 %v6413_v51, %v3579_v47  ;;  %v3580_v1 = vmul.f32 %v5025_v59, %v6408_v8  ;;  %4982 = vmatprep.mubr.msk.bf16.mxu0 %vm777_vm0, %v3672_v33 }
 0x39a   : > { %v3621_v0 = vadd.f32 %v6413_v51, %v3582_v5  ;;  %4983 = vmatmul.mubr.msk.bf16.gmra.mrb[76].mxu0 %vm777_vm0, %v3673_v23  ;;  %v3652_v63 = vmax.f32 %v3620_v62, 0.0 }
 0x39b   : > { %v3619_v22 = vadd.f32 %v6413_v51, %v3580_v1  ;;  %v4956_v19 = vpop.f32.mrb[12].mxu1  ;;  %v3650_v48 = vmax.f32 %v3618_v3, 0.0 }
 0x39c   : > { %v3653_v26 = vmax.f32 %v3621_v0, 0.0  ;;  %v5026_v28 = vadd.f32 %v4956_v19, %v6378_v29  ;;  %v3477_v11 = vpop.f32.mrb[13].mxu1 }
 0x39d   : > { %v3651_v13 = vmax.f32 %v3619_v22, 0.0  ;;  %v5027_v15 = vadd.f32 %v3477_v11, %v6380_v30  ;;  %v4957_v18 = vpop.f32.mrb[14].mxu1 }
 0x39e   : > { %v3675_v55 = vpack.c.bf16 %v3653_v26, %v3652_v63  ;;  %v3585_v25 = vmul.f32 %v5026_v28, %v6408_v8  ;;  %v5028_v39 = vadd.f32 %v4957_v18, %v6382_v32  ;;  %v3480_v49 = vpop.f32.mrb[15].mxu1 }
 0x39f   : > { %v3674_v44 = vpack.c.bf16 %v3651_v13, %v3650_v48  ;;  %v3583_v60 = vmul.f32 %v5027_v15, %v6408_v8  ;;  %v5029_v61 = vadd.f32 %v3480_v49, %v6384_v50 }
 0x3a0   : > { %v3624_v24 = vadd.f32 %v6413_v51, %v3585_v25  ;;  %v3586_v29 = vmul.f32 %v5028_v39, %v6408_v8 }
 0x3a1   : > { %v3622_v36 = vadd.f32 %v6413_v51, %v3583_v60  ;;  %v3584_v30 = vmul.f32 %v5029_v61, %v6408_v8  ;;  %4986 = vmatprep.mubr.msk.bf16.mxu0 %vm777_vm0, %v3674_v44 }
 0x3a2   : > { %v3625_v37 = vadd.f32 %v6413_v51, %v3586_v29  ;;  %4987 = vmatmul.mubr.msk.bf16.gmra.mrb[80].mxu0 %vm777_vm0, %v3675_v55  ;;  %v3656_v45 = vmax.f32 %v3624_v24, 0.0 }
 0x3a3   : > { %v3623_v32 = vadd.f32 %v6413_v51, %v3584_v30  ;;  %v4960_v38 = vpop.f32.mrb[16].mxu1  ;;  %v3654_v6 = vmax.f32 %v3622_v36, 0.0 }
 0x3a4   : > { %v3657_v35 = vmax.f32 %v3625_v37, 0.0  ;;  %v5030_v50 = vadd.f32 %v4960_v38, %v6386_v57  ;;  %v3493_v4 = vpop.f32.mrb[17].mxu1  ;;  %v5354_v37 = vld [vmem:[%s5726_s23 + $0x10] sm:$0xff] }
 0x3a5   : > { %v3655_v42 = vmax.f32 %v3623_v32, 0.0  ;;  %v5031_v7 = vadd.f32 %v3493_v4, %v6388_v9  ;;  %v4961_v54 = vpop.f32.mrb[18].mxu1 }
 0x3a6   : > { %v3677_v43 = vpack.c.bf16 %v3657_v35, %v3656_v45  ;;  %v3589_v58 = vmul.f32 %v5030_v50, %v6408_v8  ;;  %v5032_v17 = vadd.f32 %v4961_v54, %v6390_v14  ;;  %v3496_v40 = vpop.f32.mrb[19].mxu1  ;;  %v5355_v45 = vld [vmem:[%s5726_s23] sm:$0xff]  ;;  %v5357_v54 = vld [vmem:[%s5726_s23 + $0x8] sm:$0xff] }
 0x3a7   : > { %v3676_v46 = vpack.c.bf16 %v3655_v42, %v3654_v6  ;;  %v3587_v20 = vmul.f32 %v5031_v7, %v6408_v8  ;;  %v5033_v21 = vadd.f32 %v3496_v40, %v6392_v34  ;;  %v5356_v6 = vld [vmem:[%s5726_s23 + $0x18] sm:$0xff] }
 0x3a8   : > { %v3628_v27 = vadd.f32 %v6413_v51, %v3589_v58  ;;  %v3590_v57 = vmul.f32 %v5032_v17, %v6408_v8 }
 0x3a9   : > { %v3626_v52 = vadd.f32 %v6413_v51, %v3587_v20  ;;  %v3588_v9 = vmul.f32 %v5033_v21, %v6408_v8  ;;  %4990 = vmatprep.mubr.msk.bf16.mxu0 %vm777_vm0, %v3676_v46 }
 0x3aa   : > { %v3629_v56 = vadd.f32 %v6413_v51, %v3590_v57  ;;  %4991 = vmatmul.mubr.msk.bf16.gmra.mrb[84].mxu0 %vm777_vm0, %v3677_v43  ;;  %v3660_v31 = vmax.f32 %v3628_v27, 0.0 }
 0x3ab   : > { %v3627_v14 = vadd.f32 %v6413_v51, %v3588_v9  ;;  %v4964_v23 = vpop.f32.mrb[20].mxu1  ;;  %v3658_v33 = vmax.f32 %v3626_v52, 0.0 }
 0x3ac   : > { %v3661_v10 = vmax.f32 %v3629_v56, 0.0  ;;  %v5034_v34 = vadd.f32 %v4964_v23, %v6394_v41  ;;  %v3509_v12 = vpop.f32.mrb[21].mxu1  ;;  %v5358_v23 = vld [vmem:[%s5726_s23 + $0x30] sm:$0xff] }
 0x3ad   : > { %v3659_v47 = vmax.f32 %v3627_v14, 0.0  ;;  %v5035_v59 = vadd.f32 %v3509_v12, %v6396_v53  ;;  %v4965_v62 = vpop.f32.mrb[22].mxu1 }
 0x3ae   : > { %v3679_v5 = vpack.c.bf16 %v3661_v10, %v3660_v31  ;;  %v3593_v3 = vmul.f32 %v5034_v34, %v6408_v8  ;;  %v5036_v1 = vadd.f32 %v4965_v62, %v6398_v16  ;;  %v3512_v0 = vpop.f32.mrb[23].mxu1  ;;  %v5359_v34 = vld [vmem:[%s5726_s23 + $0x20] sm:$0xff] }
 0x3af   : > { %v3678_v22 = vpack.c.bf16 %v3659_v47, %v3658_v33  ;;  %v3591_v19 = vmul.f32 %v5035_v59, %v6408_v8  ;;  %v5037_v63 = vadd.f32 %v3512_v0, %v6400_v2  ;;  %v5360_v59 = vld [vmem:[%s5726_s23 + $0x38] sm:$0xff] }
 0x3b0   : > { %v3632_v26 = vadd.f32 %v6413_v51, %v3593_v3  ;;  %v3594_v41 = vmul.f32 %v5036_v1, %v6408_v8  ;;  %v5361_v3 = vld [vmem:[%s5726_s23 + $0x28] sm:$0xff] }
 0x3b1   : > { %v3630_v28 = vadd.f32 %v6413_v51, %v3591_v19  ;;  %v3592_v53 = vmul.f32 %v5037_v63, %v6408_v8  ;;  %4994 = vmatprep.mubr.msk.bf16.mxu0 %vm777_vm0, %v3678_v22  ;;  %v6522_v8 = vld [vmem:[%s6720_s8] ss:$0 sm:$0xff] }
 0x3b2   : > { %v3633_v11 = vadd.f32 %v6413_v51, %v3594_v41  ;;  %4995 = vmatmul.mubr.msk.bf16.gmra.mrb[88].mxu0 %vm777_vm0, %v3679_v5  ;;  %v3664_v48 = vmax.f32 %v3632_v26, 0.0 }
 0x3b3   : > { %v3631_v16 = vadd.f32 %v6413_v51, %v3592_v53  ;;  %v3662_v15 = vmax.f32 %v3630_v28, 0.0  ;;  %v6527_v51 = vld [vmem:[%s6721_s9] ss:$0 sm:$0xff] }
 0x3b4   : > { %v3665_v13 = vmax.f32 %v3633_v11, 0.0 }
 0x3b5   : > { %v3663_v2 = vmax.f32 %v3631_v16, 0.0 }
 0x3b6   : > { %v3681_v18 = vpack.c.bf16 %v3665_v13, %v3664_v48 }
 0x3b7   : > { %v3680_v55 = vpack.c.bf16 %v3663_v2, %v3662_v15  ;;  %v5362_v15 = vld [vmem:[%s5726_s23 + $0x50] sm:$0xff] }
 0x3b9   : > { %4998 = vmatprep.mubr.msk.bf16.mxu0 %vm777_vm0, %v3680_v55  ;;  %v5363_v55 = vld [vmem:[%s5726_s23 + $0x40] sm:$0xff] }
 0x3ba   : > { %4999 = vmatmul.mubr.msk.bf16.gmra.mrb[92].mxu0 %vm777_vm0, %v3681_v18 }
 0x455   : > { %v4972_v25 = vpop.f32.mrb[64].mxu0 }
 0x456   : > { %v3916_v39 = vmul.f32 %v4972_v25, %v6522_v8  ;;  %v3780_v49 = vpop.f32.mrb[65].mxu0 }
 0x457   : > { %v3914_v44 = vmul.f32 %v6522_v8, %v3780_v49  ;;  %v4973_v60 = vpop.f32.mrb[66].mxu0 }
 0x458   : > { %v3955_v61 = vadd.f32 %v6527_v51, %v3916_v39  ;;  %v3917_v24 = vmul.f32 %v4973_v60, %v6522_v8  ;;  %v3783_v29 = vpop.f32.mrb[67].mxu0 }
 0x459   : > { %v3953_v36 = vadd.f32 %v6527_v51, %v3914_v44  ;;  %v3915_v30 = vmul.f32 %v6522_v8, %v3783_v29  ;;  %v5364_v44 = vld [vmem:[%s5726_s23 + $0x58] sm:$0xff] }
 0x45a   : > { %v3987_v32 = vadd.f32 %v5354_v37, %v3955_v61  ;;  %v3956_v38 = vadd.f32 %v6527_v51, %v3917_v24  ;;  %v5365_v24 = vld [vmem:[%s5726_s23 + $0x48] sm:$0xff] }
 0x45b   : > { %v3985_v35 = vadd.f32 %v5355_v45, %v3953_v36  ;;  %v3954_v50 = vadd.f32 %v6527_v51, %v3915_v30 }
 0x45c   : > { %v4019_v4 = vmax.f32 %v3987_v32, 0.0  ;;  %v3988_v42 = vadd.f32 %v5356_v6, %v3956_v38 }
 0x45d   : > { %v4017_v7 = vmax.f32 %v3985_v35, 0.0  ;;  %v3986_v43 = vadd.f32 %v5357_v54, %v3954_v50  ;;  %v4976_v58 = vpop.f32.mrb[68].mxu0  ;;  %v5366_v54 = vld [vmem:[%s5726_s23 + $0x70] sm:$0xff] }
 0x45e   : > { %4051 = vst [vmem:[%s6543_s18 + $0x10] sm:$0xff] %v4019_v4  ;;  %v4020_v17 = vmax.f32 %v3988_v42, 0.0  ;;  %v3920_v40 = vmul.f32 %v4976_v58, %v6522_v8  ;;  %v3796_v46 = vpop.f32.mrb[69].mxu0 }
 0x45f   : > { %4049 = vst [vmem:[%s6543_s18] sm:$0xff] %v4017_v7  ;;  %v4018_v20 = vmax.f32 %v3986_v43, 0.0  ;;  %v3918_v21 = vmul.f32 %v6522_v8, %v3796_v46  ;;  %v4977_v27 = vpop.f32.mrb[70].mxu0 }
 0x460   : > { %4052 = vst [vmem:[%s6543_s18 + $0x18] sm:$0xff] %v4020_v17  ;;  %v3959_v57 = vadd.f32 %v6527_v51, %v3920_v40  ;;  %v3921_v52 = vmul.f32 %v4977_v27, %v6522_v8  ;;  %v3799_v9 = vpop.f32.mrb[71].mxu0  ;;  %v5367_v17 = vld [vmem:[%s5726_s23 + $0x60] sm:$0xff] }
 0x461   : > { %4050 = vst [vmem:[%s6543_s18 + $0x8] sm:$0xff] %v4018_v20  ;;  %v3957_v56 = vadd.f32 %v6527_v51, %v3918_v21  ;;  %v3919_v14 = vmul.f32 %v6522_v8, %v3799_v9  ;;  %v5368_v21 = vld [vmem:[%s5726_s23 + $0x78] sm:$0xff] }
 0x462   : > { %v3991_v31 = vadd.f32 %v5358_v23, %v3959_v57  ;;  %v3960_v10 = vadd.f32 %v6527_v51, %v3921_v52  ;;  %v5369_v52 = vld [vmem:[%s5726_s23 + $0x68] sm:$0xff] }
 0x463   : > { %v3989_v12 = vadd.f32 %v5359_v34, %v3957_v56  ;;  %v3958_v33 = vadd.f32 %v6527_v51, %v3919_v14 }
 0x464   : > { %v4023_v47 = vmax.f32 %v3991_v31, 0.0  ;;  %v3992_v62 = vadd.f32 %v5360_v59, %v3960_v10 }
 0x465   : > { %v4021_v5 = vmax.f32 %v3989_v12, 0.0  ;;  %v3990_v1 = vadd.f32 %v5361_v3, %v3958_v33  ;;  %v4980_v0 = vpop.f32.mrb[72].mxu0  ;;  %v5370_v3 = vld [vmem:[%s5726_s23 + $0x90] sm:$0xff] }
 0x466   : > { %4055 = vst [vmem:[%s6543_s18 + $0x30] sm:$0xff] %v4023_v47  ;;  %v4024_v22 = vmax.f32 %v3992_v62, 0.0  ;;  %v3924_v19 = vmul.f32 %v4980_v0, %v6522_v8  ;;  %v3812_v63 = vpop.f32.mrb[73].mxu0 }
 0x467   : > { %4053 = vst [vmem:[%s6543_s18 + $0x20] sm:$0xff] %v4021_v5  ;;  %v4022_v26 = vmax.f32 %v3990_v1, 0.0  ;;  %v3922_v41 = vmul.f32 %v6522_v8, %v3812_v63  ;;  %v4981_v28 = vpop.f32.mrb[74].mxu0 }
 0x468   : > { %4056 = vst [vmem:[%s6543_s18 + $0x38] sm:$0xff] %v4024_v22  ;;  %v3963_v53 = vadd.f32 %v6527_v51, %v3924_v19  ;;  %v3925_v11 = vmul.f32 %v4981_v28, %v6522_v8  ;;  %v3815_v16 = vpop.f32.mrb[75].mxu0  ;;  %v5371_v22 = vld [vmem:[%s5726_s23 + $0x80] sm:$0xff] }
 0x469   : > { %4054 = vst [vmem:[%s6543_s18 + $0x28] sm:$0xff] %v4022_v26  ;;  %v3961_v48 = vadd.f32 %v6527_v51, %v3922_v41  ;;  %v3923_v13 = vmul.f32 %v6522_v8, %v3815_v16  ;;  %v5372_v41 = vld [vmem:[%s5726_s23 + $0x98] sm:$0xff] }
 0x46a   : > { %v3995_v2 = vadd.f32 %v5362_v15, %v3963_v53  ;;  %v3964_v18 = vadd.f32 %v6527_v51, %v3925_v11  ;;  %v5373_v11 = vld [vmem:[%s5726_s23 + $0x88] sm:$0xff] }
 0x46b   : > { %v3993_v25 = vadd.f32 %v5363_v55, %v3961_v48  ;;  %v3962_v39 = vadd.f32 %v6527_v51, %v3923_v13 }
 0x46c   : > { %v4027_v49 = vmax.f32 %v3995_v2, 0.0  ;;  %v3996_v60 = vadd.f32 %v5364_v44, %v3964_v18 }
 0x46d   : > { %v4025_v61 = vmax.f32 %v3993_v25, 0.0  ;;  %v3994_v29 = vadd.f32 %v5365_v24, %v3962_v39  ;;  %v4984_v36 = vpop.f32.mrb[76].mxu0  ;;  %v5374_v24 = vld [vmem:[%s5726_s23 + $0xb0] sm:$0xff] }
 0x46e   : > { %4059 = vst [vmem:[%s6543_s18 + $0x50] sm:$0xff] %v4027_v49  ;;  %v4028_v30 = vmax.f32 %v3996_v60, 0.0  ;;  %v3928_v37 = vmul.f32 %v4984_v36, %v6522_v8  ;;  %v3828_v32 = vpop.f32.mrb[77].mxu0 }
 0x46f   : > { %4057 = vst [vmem:[%s6543_s18 + $0x40] sm:$0xff] %v4025_v61  ;;  %v4026_v38 = vmax.f32 %v3994_v29, 0.0  ;;  %v3926_v45 = vmul.f32 %v6522_v8, %v3828_v32  ;;  %v4985_v35 = vpop.f32.mrb[78].mxu0 }
 0x470   : > { %4060 = vst [vmem:[%s6543_s18 + $0x58] sm:$0xff] %v4028_v30  ;;  %v3967_v50 = vadd.f32 %v6527_v51, %v3928_v37  ;;  %v3929_v4 = vmul.f32 %v4985_v35, %v6522_v8  ;;  %v3831_v6 = vpop.f32.mrb[79].mxu0  ;;  %v5375_v30 = vld [vmem:[%s5726_s23 + $0xa0] sm:$0xff] }
 0x471   : > { %4058 = vst [vmem:[%s6543_s18 + $0x48] sm:$0xff] %v4026_v38  ;;  %v3965_v42 = vadd.f32 %v6527_v51, %v3926_v45  ;;  %v3927_v7 = vmul.f32 %v6522_v8, %v3831_v6  ;;  %v5376_v45 = vld [vmem:[%s5726_s23 + $0xb8] sm:$0xff] }
 0x472   : > { %v3999_v43 = vadd.f32 %v5366_v54, %v3967_v50  ;;  %v3968_v58 = vadd.f32 %v6527_v51, %v3929_v4  ;;  %v5377_v4 = vld [vmem:[%s5726_s23 + $0xa8] sm:$0xff] }
 0x473   : > { %v3997_v40 = vadd.f32 %v5367_v17, %v3965_v42  ;;  %v3966_v46 = vadd.f32 %v6527_v51, %v3927_v7 }
 0x474   : > { %v4031_v20 = vmax.f32 %v3999_v43, 0.0  ;;  %v4000_v27 = vadd.f32 %v5368_v21, %v3968_v58 }
 0x475   : > { %v4029_v57 = vmax.f32 %v3997_v40, 0.0  ;;  %v3998_v9 = vadd.f32 %v5369_v52, %v3966_v46  ;;  %v4988_v56 = vpop.f32.mrb[80].mxu0  ;;  %v5378_v52 = vld [vmem:[%s5726_s23 + $0xd0] sm:$0xff] }
 0x476   : > { %4063 = vst [vmem:[%s6543_s18 + $0x70] sm:$0xff] %v4031_v20  ;;  %v4032_v14 = vmax.f32 %v4000_v27, 0.0  ;;  %v3932_v23 = vmul.f32 %v4988_v56, %v6522_v8  ;;  %v3844_v31 = vpop.f32.mrb[81].mxu0 }
 0x477   : > { %4061 = vst [vmem:[%s6543_s18 + $0x60] sm:$0xff] %v4029_v57  ;;  %v4030_v10 = vmax.f32 %v3998_v9, 0.0  ;;  %v3930_v34 = vmul.f32 %v6522_v8, %v3844_v31  ;;  %v4989_v12 = vpop.f32.mrb[82].mxu0 }
 0x478   : > { %4064 = vst [vmem:[%s6543_s18 + $0x78] sm:$0xff] %v4032_v14  ;;  %v3971_v33 = vadd.f32 %v6527_v51, %v3932_v23  ;;  %v3933_v47 = vmul.f32 %v4989_v12, %v6522_v8  ;;  %v3847_v59 = vpop.f32.mrb[83].mxu0  ;;  %v5379_v14 = vld [vmem:[%s5726_s23 + $0xc0] sm:$0xff] }
 0x479   : > { %4062 = vst [vmem:[%s6543_s18 + $0x68] sm:$0xff] %v4030_v10  ;;  %v3969_v62 = vadd.f32 %v6527_v51, %v3930_v34  ;;  %v3931_v5 = vmul.f32 %v6522_v8, %v3847_v59  ;;  %v5380_v34 = vld [vmem:[%s5726_s23 + $0xd8] sm:$0xff] }
 0x47a   : > { %v4003_v1 = vadd.f32 %v5370_v3, %v3971_v33  ;;  %v3972_v0 = vadd.f32 %v6527_v51, %v3933_v47  ;;  %v5381_v47 = vld [vmem:[%s5726_s23 + $0xc8] sm:$0xff] }
 0x47b   : > { %v4001_v19 = vadd.f32 %v5371_v22, %v3969_v62  ;;  %v3970_v63 = vadd.f32 %v6527_v51, %v3931_v5 }
 0x47c   : > { %v4035_v26 = vmax.f32 %v4003_v1, 0.0  ;;  %v4004_v28 = vadd.f32 %v5372_v41, %v3972_v0 }
 0x47d   : > { %v4033_v53 = vmax.f32 %v4001_v19, 0.0  ;;  %v4002_v16 = vadd.f32 %v5373_v11, %v3970_v63  ;;  %v4992_v48 = vpop.f32.mrb[84].mxu0  ;;  %v5382_v11 = vld [vmem:[%s5726_s23 + $0xf0] sm:$0xff] }
 0x47e   : > { %4067 = vst [vmem:[%s6543_s18 + $0x90] sm:$0xff] %v4035_v26  ;;  %v4036_v13 = vmax.f32 %v4004_v28, 0.0  ;;  %v3936_v15 = vmul.f32 %v4992_v48, %v6522_v8  ;;  %v3860_v2 = vpop.f32.mrb[85].mxu0 }
 0x47f   : > { %4065 = vst [vmem:[%s6543_s18 + $0x80] sm:$0xff] %v4033_v53  ;;  %v4034_v18 = vmax.f32 %v4002_v16, 0.0  ;;  %v3934_v55 = vmul.f32 %v6522_v8, %v3860_v2  ;;  %v4993_v25 = vpop.f32.mrb[86].mxu0 }
 0x480   : > { %4068 = vst [vmem:[%s6543_s18 + $0x98] sm:$0xff] %v4036_v13  ;;  %v3975_v39 = vadd.f32 %v6527_v51, %v3936_v15  ;;  %v3937_v49 = vmul.f32 %v4993_v25, %v6522_v8  ;;  %v3863_v44 = vpop.f32.mrb[87].mxu0  ;;  %v5383_v13 = vld [vmem:[%s5726_s23 + $0xe0] sm:$0xff] }
 0x481   : > { %4066 = vst [vmem:[%s6543_s18 + $0x88] sm:$0xff] %v4034_v18  ;;  %v3973_v60 = vadd.f32 %v6527_v51, %v3934_v55  ;;  %v3935_v61 = vmul.f32 %v6522_v8, %v3863_v44  ;;  %v5384_v55 = vld [vmem:[%s5726_s23 + $0xf8] sm:$0xff] }
 0x482   : > { %v4007_v29 = vadd.f32 %v5374_v24, %v3975_v39  ;;  %v3976_v36 = vadd.f32 %v6527_v51, %v3937_v49 }
 0x483   : > { %v4005_v37 = vadd.f32 %v5375_v30, %v3973_v60  ;;  %v3974_v32 = vadd.f32 %v6527_v51, %v3935_v61 }
 0x484   : > { %v4039_v38 = vmax.f32 %v4007_v29, 0.0  ;;  %v4008_v35 = vadd.f32 %v5376_v45, %v3976_v36 }
 0x485   : > { %v4037_v50 = vmax.f32 %v4005_v37, 0.0  ;;  %v4006_v6 = vadd.f32 %v5377_v4, %v3974_v32  ;;  %v4996_v42 = vpop.f32.mrb[88].mxu0 }
 0x486   : > { %4071 = vst [vmem:[%s6543_s18 + $0xb0] sm:$0xff] %v4039_v38  ;;  %v4040_v7 = vmax.f32 %v4008_v35, 0.0  ;;  %v3940_v54 = vmul.f32 %v4996_v42, %v6522_v8  ;;  %v3876_v43 = vpop.f32.mrb[89].mxu0 }
 0x487   : > { %4069 = vst [vmem:[%s6543_s18 + $0xa0] sm:$0xff] %v4037_v50  ;;  %v4038_v58 = vmax.f32 %v4006_v6, 0.0  ;;  %v3938_v17 = vmul.f32 %v6522_v8, %v3876_v43  ;;  %v4997_v40 = vpop.f32.mrb[90].mxu0 }
 0x488   : > { %4072 = vst [vmem:[%s6543_s18 + $0xb8] sm:$0xff] %v4040_v7  ;;  %v3979_v46 = vadd.f32 %v6527_v51, %v3940_v54  ;;  %v3941_v20 = vmul.f32 %v4997_v40, %v6522_v8  ;;  %v3879_v21 = vpop.f32.mrb[91].mxu0 }
 0x489   : > { %4070 = vst [vmem:[%s6543_s18 + $0xa8] sm:$0xff] %v4038_v58  ;;  %v3977_v27 = vadd.f32 %v6527_v51, %v3938_v17  ;;  %v3939_v57 = vmul.f32 %v6522_v8, %v3879_v21 }
 0x48a   : > { %v4011_v9 = vadd.f32 %v5378_v52, %v3979_v46  ;;  %v3980_v56 = vadd.f32 %v6527_v51, %v3941_v20 }
 0x48b   : > { %v4009_v23 = vadd.f32 %v5379_v14, %v3977_v27  ;;  %v3978_v31 = vadd.f32 %v6527_v51, %v3939_v57 }
 0x48c   : > { %v4043_v10 = vmax.f32 %v4011_v9, 0.0  ;;  %v4012_v12 = vadd.f32 %v5380_v34, %v3980_v56 }
 0x48d   : > { %v4041_v33 = vmax.f32 %v4009_v23, 0.0  ;;  %v4010_v59 = vadd.f32 %v5381_v47, %v3978_v31  ;;  %v5000_v62 = vpop.f32.mrb[92].mxu0 }
 0x48e   : > { %4075 = vst [vmem:[%s6543_s18 + $0xd0] sm:$0xff] %v4043_v10  ;;  %v4044_v5 = vmax.f32 %v4012_v12, 0.0  ;;  %v3944_v3 = vmul.f32 %v5000_v62, %v6522_v8  ;;  %v3892_v1 = vpop.f32.mrb[93].mxu0 }
 0x48f   : > { %4073 = vst [vmem:[%s6543_s18 + $0xc0] sm:$0xff] %v4041_v33  ;;  %v4042_v0 = vmax.f32 %v4010_v59, 0.0  ;;  %v3942_v22 = vmul.f32 %v6522_v8, %v3892_v1  ;;  %v5001_v19 = vpop.f32.mrb[94].mxu0 }
 0x490   : > { %4076 = vst [vmem:[%s6543_s18 + $0xd8] sm:$0xff] %v4044_v5  ;;  %v3983_v63 = vadd.f32 %v6527_v51, %v3944_v3  ;;  %v3945_v26 = vmul.f32 %v5001_v19, %v6522_v8  ;;  %v3895_v41 = vpop.f32.mrb[95].mxu0 }
 0x491   : > { %4074 = vst [vmem:[%s6543_s18 + $0xc8] sm:$0xff] %v4042_v0  ;;  %v3981_v28 = vadd.f32 %v6527_v51, %v3942_v22  ;;  %v3943_v53 = vmul.f32 %v6522_v8, %v3895_v41  ;;  %v5385_v8 = vld [vmem:[%s5726_s23 + $0xe8] sm:$0xff]  ;;  %s5523_s23 = smov [#allocation8]  }
 0x492   : > { %v4015_v16 = vadd.f32 %v5382_v11, %v3983_v63  ;;  %v3984_v48 = vadd.f32 %v6527_v51, %v3945_v26  ;;  %s5448_s28 = sshll.u32 %s5523_s23, 4  ;;  %s5449_s28 = int_to_ptr.vmem [resolvable:$false] %s5448_s28 }
 0x493   : > { %v4013_v15 = vadd.f32 %v5383_v13, %v3981_v28  ;;  %v3982_v2 = vadd.f32 %v6527_v51, %v3943_v53  ;;  %s5450_s13 = scalar_lea.vmem %s5449_s28, 8192  ;;  %p5451_p10 = scmp.lt.s32.totalorder %s6665_s21, %s5449_s28 }
 0x494   : > { %v4047_v18 = vmax.f32 %v4015_v16, 0.0  ;;  %v4016_v25 = vadd.f32 %v5384_v55, %v3984_v48  ;;  %p5452_p13 = scmp.lt.s32.totalorder %s5450_s13, %s5444_s19 }
 0x495   : > { %v4045_v39 = vmax.f32 %v4013_v15, 0.0  ;;  %v4014_v49 = vadd.f32 %v5385_v8, %v3982_v2 }
 0x496   : > { %4079 = vst [vmem:[%s6543_s18 + $0xf0] sm:$0xff] %v4047_v18  ;;  %v4048_v44 = vmax.f32 %v4016_v25, 0.0  ;;  %p5453_p3 = por %p5452_p13, %p5451_p10 }
 0x497   : > { %4077 = vst [vmem:[%s6543_s18 + $0xe0] sm:$0xff] %v4045_v39  ;;  %v4046_v51 = vmax.f32 %v4014_v49, 0.0 }
 0x498   : > { %4080 = vst [vmem:[%s6543_s18 + $0xf8] sm:$0xff] %v4048_v44  ;;  %p5454_p7 = pnand %p5453_p3, %p5447_p8 }
 0x499   : > { %4078 = vst [vmem:[%s6543_s18 + $0xe8] sm:$0xff] %v4046_v51 }
 0x49a   : > { %5457 = shalt.err (!%p5454_p7)
}
 0x49b   : > { %s5458_s20 = scalar_lea.hbm %s6663_s27, 4096  ;;  %s5462_s18 = scalar_lea.hbm %s6722_s10, 8192 }
 0x49c   : > { %p5459_p9 = scmp.ne.s32.totalorder %s6663_s27, %s5458_s20  ;;  %p5463_p5 = scmp.lt.u32.totalorder %s6663_s27, %s6722_s10 }
 0x49d   : > { %p5464_p11 = scmp.lt.u32.totalorder %s5462_s18, %s5458_s20  ;;  %p5466_p4 = scmp.lt.u32.totalorder %s5458_s20, %s6663_s27 }
 0x49e   : > { %p5460_p2 = pnand %p5459_p9, %p5672_p12 }
 0x49f   : > { %p5465_p1 = por %p5464_p11, %p5463_p5 }
 0x4a0   : > { %p5461_p0 = pneg %p5460_p2 }
 0x4a1   : > { %p5467_p6 = por %p5466_p4, %p5465_p1 }
 0x4a3   : > { %p5468_p8 = pnand %p5467_p6, %p5461_p0 }
 0x4a5   : > { %5471 = shalt.err (!%p5468_p8)
}
 0x4a6   : > { %s5524_s26 = smov 128   ;;  %s5525_s19 = smov 8  }
 0x4a7   : > { %5268 = dma.vmem_to_hbm [thread:$0]  (%p5672_p12), %s6665_s21, 4096, %s6663_s27, %s4082_s17, %s5524_s26, %s5524_s26, %s5525_s19  }
 0x4a8 PF: > { %s6744_s23 = sld [smem:[#allocation12_spill]]  ;;  %s6745_s28 = sld [smem:[#allocation13_spill]] }
 0x4a9   : > { %p6747_p13 = scmp.ge.s32.totalorder %s5514_s16, 2 }
 0x4ae   : > { %s4110_s13 = sand.u32 1, %s6744_s23   ;;  %p6746_p10 = scmp.ne.s32.totalorder %s6745_s28, 0 }
 0x4af   : > { %s4111_s20 = scalar_lea.sflag [#allocation5], %s4110_s13 }
 0x4b0   : > { %p5279_p3 = pnand %p6747_p13, %p6746_p10 }
 0x4b2   : > { %5497 = dma.done.wait (!%p5279_p3), %s4111_s20, 4096  }
 0x4b3   : > { %5499 = vsyncadd (!%p5279_p3), %s4111_s20, 4294963200  ;;  %s6748_s16 = sld [smem:[#allocation14_spill]]  ;;  %s6749_s13 = smov %s5506_s14 }
 0x4b4   : > { %s6750_s14 = smov %s5510_s15  ;;  %s6751_s15 = smov %s5668_s25 }
 0x4b9   : > { %p24_p7 = scmp.ge.s32.totalorder %s6748_s16, 4  }
 0x4bb   :  { %26 = sbr.rel (!%p24_p7) target bundleno = 6 (0x6), region = 119 }
 0x4c2   :  { %4116 = vsyncpa [#allocation4], 1 }
 0x4c3   :  { %4118 = vsyncpa [#allocation4 + $0x1], 1 }
 0x4c4   :  { %4119 = vsyncpa [#allocation7], 1 }
 0x4c5   :  { %4120 = vsyncpa [#allocation5], 1 }
 0x4c6   :  { %4122 = vsyncpa [#allocation5 + $0x1], 1 }

</bundles_post_ra>
